<compile_context>
chip_gen: v6e
topology: v6e:2x2x1
jax: 0.10.0
libtpu: 0.0.40
codegen_flags: <defaults>
</compile_context>

<pallas_src>
import functools
import jax
import jax.numpy as jnp
from jax import lax
from jax.experimental import pallas as pl
from jax.experimental.pallas import tpu as pltpu


# A(M,K) contracted with B(N,K) -> (M,N); lets the MXU consume the PyTorch
# (out_features, in_features) weight layout without an explicit transpose.
_CONTRACT_LAST = (((1,), (1,)), ((), ()))


def _act(name, x):
    if name == "relu":
        return jnp.maximum(x, 0.0)
    if name in ("gelu_new", "gelu_pytorch_tanh"):
        return jax.nn.gelu(x, approximate=True)
    if name == "gelu":
        return jax.nn.gelu(x, approximate=False)
    raise ValueError(f"unsupported dense_act_fn: {name}")


def _t5_ff_kernel(*refs, is_gated, act_name, eps):
    if is_gated:
        (x_ref, nw_ref, wg_ref, wu_ref, wd_ref, out_ref, xn_ref, acc_ref) = refs
    else:
        (x_ref, nw_ref, wu_ref, wd_ref, out_ref, xn_ref, acc_ref) = refs
        wg_ref = None

    j = pl.program_id(1)

    # --- per row-tile init: T5 RMSNorm (f32 stats) + zero the accumulator ---
    @pl.when(j == 0)
    def _():
        x = x_ref[...].astype(jnp.float32)
        var = jnp.mean(x * x, axis=-1, keepdims=True)
        xn = (x * lax.rsqrt(var + eps)) * nw_ref[...].astype(jnp.float32)
        xn_ref[...] = xn.astype(xn_ref.dtype)
        acc_ref[...] = jnp.zeros_like(acc_ref)

    # --- FFN on this d_ff tile, accumulate the down-projection ---
    xn = xn_ref[...]                                     # (TM, D), input dtype
    up = lax.dot_general(xn, wu_ref[...], _CONTRACT_LAST,
                         preferred_element_type=jnp.float32)   # (TM, TF)
    if is_gated:
        gate = lax.dot_general(xn, wg_ref[...], _CONTRACT_LAST,
                               preferred_element_type=jnp.float32)
        h = _act(act_name, gate) * up
    else:
        h = _act(act_name, up)
    h = h.astype(xn_ref.dtype)                           # back to MXU-rate dtype
    acc_ref[...] += lax.dot_general(h, wd_ref[...], _CONTRACT_LAST,
                                    preferred_element_type=jnp.float32)  # (TM, D)

    # --- finalize: residual add, cast, store ---
    @pl.when(j == pl.num_programs(1) - 1)
    def _():
        out_ref[...] = (x_ref[...].astype(jnp.float32)
                        + acc_ref[...]).astype(out_ref.dtype)


def _round_up(a, b):
    return -(-a // b) * b


def _round_down(a, b):
    return (a // b) * b


def _vmem_budget_bytes():
    """Generation-aware VMEM budget: physical capacity with ~15% headroom."""
    try:
        cap = int(pltpu.get_tpu_info().vmem_capacity_bytes)
    except Exception:
        cap = 64 * 1024 * 1024  # conservative fallback (v7x per-TC size)
    return int(cap * 0.85)


def _largest_divisor_tile(total, target, quantum):
    """Largest t <= min(target, total) with t % quantum == 0 and total % t == 0."""
    t = _round_down(min(target, total), quantum)
    while t >= quantum:
        if total % t == 0:
            return t
        t -= quantum
    return None


def _pick_tm(rows8, target):
    """Row tile <= target (sublane-aligned), preferring 256-aligned divisors of
    rows8 so no wrapper pad/slice is needed; falls back to a ragged tile."""
    tm = min(max(8, _round_down(target, 8)), rows8)
    for q in (256, 8):
        t = _largest_divisor_tile(rows8, tm, q)
        if t is not None and 2 * t >= tm:
            return t
    return tm


def _workset_bytes(tm, tf, d_model, d_ff, dbytes, n_mm, weights_resident):
    """Rough VMEM working-set model used to size TM / TF against the budget."""
    # x (2-buf) + out (2-buf) + xn scratch + f32 accumulator
    act = tm * d_model * (2 * dbytes + 2 * dbytes + dbytes + 4)
    w_cols = d_ff if weights_resident else tf
    w = 2 * n_mm * w_cols * d_model * dbytes          # weight tiles, 2-buffered
    tmp = n_mm * tm * tf * 4                          # gate/up/h f32 temporaries
    return act + w + tmp + (4 << 20)                  # Mosaic internal scratch slack


def t5_layer_ff(hidden, norm_w, wo, wi_up, wi_gate=None, *,
                is_gated, dense_act_fn, eps,
                block_rows=None, block_ff=None):
    """T5LayerFF forward.

    hidden: (B, S, D); norm_w: (D,)
    wi_up  ('wi' or 'wi_1'): (d_ff, D)   [PyTorch (out, in) layout]
    wi_gate('wi_0', gated only): (d_ff, D)
    wo: (D, d_ff)
    """
    B, S, D = hidden.shape
    dtype = hidden.dtype
    dbytes = jnp.dtype(dtype).itemsize
    d_ff = wi_up.shape[0]
    assert wi_up.shape == (d_ff, D)
    assert wo.shape == (D, d_ff)
    if is_gated:
        assert wi_gate is not None and wi_gate.shape == (d_ff, D)
    n_mm = 3 if is_gated else 2

    budget = _vmem_budget_bytes()
    big_vmem = budget >= (96 << 20)      # v5e/v6e-class (128 MiB physical)
    tm_target = block_rows if block_rows is not None else (1024 if big_vmem else 512)
    tf_target = 512 if big_vmem else 256

    # --- row tiling (flatten batch*seq) ---
    R = B * S
    R8 = _round_up(R, 8)
    TM = _pick_tm(R8, tm_target)

    # --- d_ff tiling (reduction axis of the down-projection) ---
    if block_ff is not None:
        TF = block_ff
        assert d_ff % TF == 0, "block_ff must divide d_ff"
        if TF != d_ff:
            assert TF % 128 == 0, "block_ff must be lane-dense (multiple of 128)"
    else:
        # Residency heuristic: if all weights + activations fit the budget, keep
        # TF = d_ff so weight block indices never change (DMA'd once per call);
        # otherwise stream d_ff tiles sized to the budget / MXU width.
        if _workset_bytes(TM, d_ff, D, d_ff, dbytes, n_mm, True) <= budget:
            TF = d_ff
        else:
            TF = (_largest_divisor_tile(d_ff, tf_target, 256)
                  or _largest_divisor_tile(d_ff, tf_target, 128)
                  or d_ff)

    # Shrink the row tile until the working set fits the VMEM budget.
    while TM > 64 and _workset_bytes(TM, TF, D, d_ff, dbytes, n_mm,
                                     TF == d_ff) > budget:
        TM = _pick_tm(R8, max(64, TM // 2))

    n_f = d_ff // TF
    R_pad = _round_up(R8, TM)

    x2d = hidden.reshape(R, D)
    if R_pad != R:
        # Padded rows are all-zero: RMSNorm/FFN of zeros is zero, residual zero.
        x2d = jnp.pad(x2d, ((0, R_pad - R), (0, 0)))

    nw2d = norm_w.reshape(1, D)

    kernel = functools.partial(_t5_ff_kernel, is_gated=is_gated,
                               act_name=dense_act_fn, eps=eps)

    wi_spec = pl.BlockSpec((TF, D), lambda i, j: (j, 0))
    wo_spec = pl.BlockSpec((D, TF), lambda i, j: (0, j))
    if is_gated:
        weight_inputs = (wi_gate, wi_up, wo)
        weight_specs = [wi_spec, wi_spec, wo_spec]
    else:
        weight_inputs = (wi_up, wo)
        weight_specs = [wi_spec, wo_spec]

    out2d = pl.pallas_call(
        kernel,
        out_shape=jax.ShapeDtypeStruct((R_pad, D), dtype),
        grid=(R_pad // TM, n_f),
        in_specs=[pl.BlockSpec((TM, D), lambda i, j: (i, 0)),
                  pl.BlockSpec((1, D), lambda i, j: (0, 0))] + weight_specs,
        out_specs=pl.BlockSpec((TM, D), lambda i, j: (i, 0)),
        scratch_shapes=[pltpu.VMEM((TM, D), dtype),        # normed rows (reused over j)
                        pltpu.VMEM((TM, D), jnp.float32)], # down-proj accumulator
        compiler_params=pltpu.CompilerParams(
            dimension_semantics=("parallel", "arbitrary"),
            vmem_limit_bytes=int(budget)),
    )(x2d, nw2d, *weight_inputs)

    if R_pad != R:
        out2d = out2d[:R]
    return out2d.reshape(B, S, D)


def _reference(hidden, norm_w, wo, wi_up, wi_gate, *, is_gated, dense_act_fn, eps):
    x = hidden.astype(jnp.float32)
    var = jnp.mean(x * x, axis=-1, keepdims=True)
    xn = x * lax.rsqrt(var + eps) * norm_w.astype(jnp.float32)
    xn = xn.astype(hidden.dtype).astype(jnp.float32)
    up = xn @ wi_up.T.astype(jnp.float32)
    if is_gated:
        gate = xn @ wi_gate.T.astype(jnp.float32)
        h = _act(dense_act_fn, gate) * up
    else:
        h = _act(dense_act_fn, up)
    h = h.astype(hidden.dtype).astype(jnp.float32)
    out = h @ wo.T.astype(jnp.float32)
    return (x + out).astype(hidden.dtype)


if __name__ == "__main__":
    # Small lane-dense config consistent with the module: d_model=256, d_ff=512.
    B, S, d_model, d_ff = 2, 16, 256, 512
    eps = 1e-6
    dtype = jnp.float32

    key = jax.random.PRNGKey(0)
    k0, k1, k2, k3, k4 = jax.random.split(key, 5)
    hidden = jax.random.normal(k0, (B, S, d_model), dtype)
    norm_w = 1.0 + 0.1 * jax.random.normal(k1, (d_model,), dtype)
    wi_gate = 0.02 * jax.random.normal(k2, (d_ff, d_model), dtype)  # 'wi_0'
    wi_up = 0.02 * jax.random.normal(k3, (d_ff, d_model), dtype)    # 'wi_1' / 'wi'
    wo = 0.02 * jax.random.normal(k4, (d_model, d_ff), dtype)       # 'wo'

    ref_g = _reference(hidden, norm_w, wo, wi_up, wi_gate,
                       is_gated=True, dense_act_fn="gelu_new", eps=eps)
    ref_r = _reference(hidden, norm_w, wo, wi_up, None,
                       is_gated=False, dense_act_fn="relu", eps=eps)

    # 1) Gated-GELU (T5 v1.1), explicit block_ff=256: exercises the streamed
    #    d_ff reduction grid axis (n_f > 1) with the f32 accumulator.
    out_g = t5_layer_ff(hidden, norm_w, wo, wi_up, wi_gate,
                        is_gated=True, dense_act_fn="gelu_new", eps=eps,
                        block_ff=256)
    out_g = jax.block_until_ready(out_g)
    assert out_g.shape == (B, S, d_model)
    assert jnp.allclose(out_g, ref_g, rtol=1e-3, atol=1e-3), \
        float(jnp.max(jnp.abs(out_g - ref_g)))

    # 2) Gated-GELU with auto tiling: exercises the weight-residency heuristic
    #    (TF = d_ff, weights DMA'd once, n_f = 1).
    out_ga = t5_layer_ff(hidden, norm_w, wo, wi_up, wi_gate,
                         is_gated=True, dense_act_fn="gelu_new", eps=eps)
    out_ga = jax.block_until_ready(out_ga)
    assert jnp.allclose(out_ga, ref_g, rtol=1e-3, atol=1e-3), \
        float(jnp.max(jnp.abs(out_ga - ref_g)))

    # 3) Non-gated ReLU path (original T5), auto tiling.
    out_r = t5_layer_ff(hidden, norm_w, wo, wi_up, None,
                        is_gated=False, dense_act_fn="relu", eps=eps)
    out_r = jax.block_until_ready(out_r)
    assert jnp.allclose(out_r, ref_r, rtol=1e-3, atol=1e-3), \
        float(jnp.max(jnp.abs(out_r - ref_r)))

    print("KERNEL_OK")
</pallas_src>

<mosaic_0001>
module attributes {stable_mosaic.version = 11 : i64} {
  func.func @_t5_ff_kernel(%arg0: i32, %arg1: i32, %arg2: memref<32x256xf32, #tpu.memory_space<vmem>>, %arg3: memref<1x256xf32, #tpu.memory_space<vmem>>, %arg4: memref<256x256xf32, #tpu.memory_space<vmem>>, %arg5: memref<256x256xf32, #tpu.memory_space<vmem>>, %arg6: memref<256x256xf32, #tpu.memory_space<vmem>>, %arg7: memref<32x256xf32, #tpu.memory_space<vmem>>, %arg8: memref<32x256xf32, #tpu.memory_space<vmem>>, %arg9: memref<32x256xf32, #tpu.memory_space<vmem>>) attributes {dimension_semantics = [#tpu.dimension_semantics<parallel>, #tpu.dimension_semantics<arbitrary>], iteration_bounds = array<i64: 1, 2>, scalar_prefetch = 0 : i64, scratch_operands = 2 : i64, tpu.core_type = #tpu.core_type<tc>, window_params = [{transform_indices = @transform_0, window_bounds = array<i64: 32, 256>}, {pipeline_mode = #tpu.pipeline_mode<synchronous>, transform_indices = @transform_1, window_bounds = array<i64: 1, 256>}, {transform_indices = @transform_2, window_bounds = array<i64: 256, 256>}, {transform_indices = @transform_3, window_bounds = array<i64: 256, 256>}, {transform_indices = @transform_4, window_bounds = array<i64: 256, 256>}, {transform_indices = @transform_5, window_bounds = array<i64: 32, 256>}]} {
    %c0_i32 = arith.constant 0 : i32
    %0 = arith.cmpi eq, %arg1, %c0_i32 : i32
    %1 = arith.extui %0 : i1 to i32
    %c0_i32_0 = arith.constant 0 : i32
    %2 = arith.cmpi ne, %1, %c0_i32_0 : i32
    scf.if %2 {
      %c0_19 = arith.constant 0 : index
      %c0_20 = arith.constant 0 : index
      %30 = vector.load %arg2[%c0_19, %c0_20] : memref<32x256xf32, #tpu.memory_space<vmem>>, vector<32x256xf32>
      %31 = arith.mulf %30, %30 : vector<32x256xf32>
      %cst_21 = arith.constant dense<0.000000e+00> : vector<32xf32>
      %32 = vector.multi_reduction <add>, %31, %cst_21 [1] : vector<32x256xf32> to vector<32xf32>
      %33 = vector.shape_cast %32 : vector<32xf32> to vector<32x1xf32>
      %cst_22 = arith.constant 2.560000e+02 : f32
      %34 = vector.broadcast %cst_22 : f32 to vector<32x1xf32>
      %35 = arith.divf %33, %34 : vector<32x1xf32>
      %cst_23 = arith.constant 9.99999997E-7 : f32
      %36 = vector.broadcast %cst_23 : f32 to vector<32x1xf32>
      %37 = arith.addf %35, %36 : vector<32x1xf32>
      %38 = math.rsqrt %37 : vector<32x1xf32>
      %39 = vector.broadcast %38 : vector<32x1xf32> to vector<32x256xf32>
      %40 = arith.mulf %30, %39 : vector<32x256xf32>
      %c0_24 = arith.constant 0 : index
      %c0_25 = arith.constant 0 : index
      %41 = vector.load %arg3[%c0_24, %c0_25] : memref<1x256xf32, #tpu.memory_space<vmem>>, vector<1x256xf32>
      %42 = vector.broadcast %41 : vector<1x256xf32> to vector<32x256xf32>
      %43 = arith.mulf %40, %42 : vector<32x256xf32>
      %c0_26 = arith.constant 0 : index
      %c0_27 = arith.constant 0 : index
      %44 = vector.load %arg8[%c0_26, %c0_27] : memref<32x256xf32, #tpu.memory_space<vmem>>, vector<32x256xf32>
      tpu.vector_store %arg8[%c0_26, %c0_27], %43 {strides = array<i32>} : memref<32x256xf32, #tpu.memory_space<vmem>>, vector<32x256xf32>,
      %cst_28 = arith.constant 0.000000e+00 : f32
      %45 = vector.broadcast %cst_28 : f32 to vector<32x256xf32>
      %c0_29 = arith.constant 0 : index
      %c0_30 = arith.constant 0 : index
      %46 = vector.load %arg9[%c0_29, %c0_30] : memref<32x256xf32, #tpu.memory_space<vmem>>, vector<32x256xf32>
      tpu.vector_store %arg9[%c0_29, %c0_30], %45 {strides = array<i32>} : memref<32x256xf32, #tpu.memory_space<vmem>>, vector<32x256xf32>,
    } else {
    }
    %c0 = arith.constant 0 : index
    %c0_1 = arith.constant 0 : index
    %3 = vector.load %arg8[%c0, %c0_1] : memref<32x256xf32, #tpu.memory_space<vmem>>, vector<32x256xf32>
    %c0_2 = arith.constant 0 : index
    %c0_3 = arith.constant 0 : index
    %4 = vector.load %arg5[%c0_2, %c0_3] : memref<256x256xf32, #tpu.memory_space<vmem>>, vector<256x256xf32>
    %cst = arith.constant dense<0.000000e+00> : vector<32x256xf32>
    %5 = tpu.matmul %3, %4, %cst {dimension_numbers = #tpu.dot_dimension_numbers<[1], [1], [0], [0], [0, 0, 1, 0], [], []>} : vector<32x256xf32>, vector<256x256xf32>, vector<32x256xf32> -> vector<32x256xf32>
    %c0_4 = arith.constant 0 : index
    %c0_5 = arith.constant 0 : index
    %6 = vector.load %arg4[%c0_4, %c0_5] : memref<256x256xf32, #tpu.memory_space<vmem>>, vector<256x256xf32>
    %cst_6 = arith.constant dense<0.000000e+00> : vector<32x256xf32>
    %7 = tpu.matmul %3, %6, %cst_6 {dimension_numbers = #tpu.dot_dimension_numbers<[1], [1], [0], [0], [0, 0, 1, 0], [], []>} : vector<32x256xf32>, vector<256x256xf32>, vector<32x256xf32> -> vector<32x256xf32>
    %8 = arith.mulf %7, %7 : vector<32x256xf32>
    %9 = arith.mulf %7, %8 : vector<32x256xf32>
    %cst_7 = arith.constant 4.471500e-02 : f32
    %10 = vector.broadcast %cst_7 : f32 to vector<32x256xf32>
    %11 = arith.mulf %10, %9 : vector<32x256xf32>
    %12 = arith.addf %7, %11 : vector<32x256xf32>
    %cst_8 = arith.constant 0.797884583 : f32
    %13 = vector.broadcast %cst_8 : f32 to vector<32x256xf32>
    %14 = arith.mulf %13, %12 : vector<32x256xf32>
    %15 = math.tanh %14 : vector<32x256xf32>
    %cst_9 = arith.constant 1.000000e+00 : f32
    %16 = vector.broadcast %cst_9 : f32 to vector<32x256xf32>
    %17 = arith.addf %16, %15 : vector<32x256xf32>
    %cst_10 = arith.constant 5.000000e-01 : f32
    %18 = vector.broadcast %cst_10 : f32 to vector<32x256xf32>
    %19 = arith.mulf %18, %17 : vector<32x256xf32>
    %20 = arith.mulf %7, %19 : vector<32x256xf32>
    %21 = arith.mulf %20, %5 : vector<32x256xf32>
    %c0_11 = arith.constant 0 : index
    %c0_12 = arith.constant 0 : index
    %22 = vector.load %arg9[%c0_11, %c0_12] : memref<32x256xf32, #tpu.memory_space<vmem>>, vector<32x256xf32>
    %c0_13 = arith.constant 0 : index
    %c0_14 = arith.constant 0 : index
    %23 = vector.load %arg6[%c0_13, %c0_14] : memref<256x256xf32, #tpu.memory_space<vmem>>, vector<256x256xf32>
    %cst_15 = arith.constant dense<0.000000e+00> : vector<32x256xf32>
    %24 = tpu.matmul %21, %23, %cst_15 {dimension_numbers = #tpu.dot_dimension_numbers<[1], [1], [0], [0], [0, 0, 1, 0], [], []>} : vector<32x256xf32>, vector<256x256xf32>, vector<32x256xf32> -> vector<32x256xf32>
    %25 = arith.addf %22, %24 : vector<32x256xf32>
    %c0_16 = arith.constant 0 : index
    %c0_17 = arith.constant 0 : index
    %26 = vector.load %arg9[%c0_16, %c0_17] : memref<32x256xf32, #tpu.memory_space<vmem>>, vector<32x256xf32>
    tpu.vector_store %arg9[%c0_16, %c0_17], %25 {strides = array<i32>} : memref<32x256xf32, #tpu.memory_space<vmem>>, vector<32x256xf32>,
    %c1_i32 = arith.constant 1 : i32
    %27 = arith.cmpi eq, %arg1, %c1_i32 : i32
    %28 = arith.extui %27 : i1 to i32
    %c0_i32_18 = arith.constant 0 : i32
    %29 = arith.cmpi ne, %28, %c0_i32_18 : i32
    scf.if %29 {
      %c0_19 = arith.constant 0 : index
      %c0_20 = arith.constant 0 : index
      %30 = vector.load %arg2[%c0_19, %c0_20] : memref<32x256xf32, #tpu.memory_space<vmem>>, vector<32x256xf32>
      %c0_21 = arith.constant 0 : index
      %c0_22 = arith.constant 0 : index
      %31 = vector.load %arg9[%c0_21, %c0_22] : memref<32x256xf32, #tpu.memory_space<vmem>>, vector<32x256xf32>
      %32 = arith.addf %30, %31 : vector<32x256xf32>
      %c0_23 = arith.constant 0 : index
      %c0_24 = arith.constant 0 : index
      %33 = vector.load %arg7[%c0_23, %c0_24] : memref<32x256xf32, #tpu.memory_space<vmem>>, vector<32x256xf32>
      tpu.vector_store %arg7[%c0_23, %c0_24], %32 {strides = array<i32>} : memref<32x256xf32, #tpu.memory_space<vmem>>, vector<32x256xf32>,
    } else {
    }
    return
  }
  func.func @transform_0(%arg0: i32, %arg1: i32) -> (i32, i32) {
    %c0_i32 = arith.constant 0 : i32
    %c0_i32_0 = arith.constant 0 : i32
    return %arg0, %c0_i32 : i32, i32
  }
  func.func @transform_1(%arg0: i32, %arg1: i32) -> (i32, i32) {
    %c0_i32 = arith.constant 0 : i32
    %c0_i32_0 = arith.constant 0 : i32
    %c0_i32_1 = arith.constant 0 : i32
    return %c0_i32, %c0_i32_0 : i32, i32
  }
  func.func @transform_2(%arg0: i32, %arg1: i32) -> (i32, i32) {
    %c0_i32 = arith.constant 0 : i32
    %c0_i32_0 = arith.constant 0 : i32
    return %arg1, %c0_i32 : i32, i32
  }
  func.func @transform_3(%arg0: i32, %arg1: i32) -> (i32, i32) {
    %c0_i32 = arith.constant 0 : i32
    %c0_i32_0 = arith.constant 0 : i32
    return %arg1, %c0_i32 : i32, i32
  }
  func.func @transform_4(%arg0: i32, %arg1: i32) -> (i32, i32) {
    %c0_i32 = arith.constant 0 : i32
    %c0_i32_0 = arith.constant 0 : i32
    return %c0_i32, %arg1 : i32, i32
  }
  func.func @transform_5(%arg0: i32, %arg1: i32) -> (i32, i32) {
    %c0_i32 = arith.constant 0 : i32
    %c0_i32_0 = arith.constant 0 : i32
    return %arg0, %c0_i32 : i32, i32
  }
}

</mosaic_0001>

<bundles_post_ra>
// kernel: tpu_custom_call.1
= control target key start
LH: loop header
LB: loop body
LE: loop exit
PB: predicated region body
PF: predicated region fallthrough
CT: control target
= control target key end

     0   :  { %s2133_s0 = inlined_call_operand.hbm [shape: f32[32,256], index: 0, kind: input, shape index: {}]   ;;  %s2134_s1 = inlined_call_operand.hbm [shape: f32[1,256], index: 1, kind: input, shape index: {}]   ;;  %s2135_s2 = inlined_call_operand.hbm [shape: f32[512,256], index: 2, kind: input, shape index: {}]   ;;  %s2136_s3 = inlined_call_operand.hbm [shape: f32[512,256], index: 3, kind: input, shape index: {}]   ;;  %s2137_s4 = inlined_call_operand.hbm [shape: f32[256,512], index: 4, kind: input, shape index: {}]   ;;  %s2138_s5 = inlined_call_operand.hbm [shape: f32[32,256], index: 5, kind: output, shape index: {}]  }
   0x1   :  { %2145 = sst [smem:[#allocation18_spill]] %s2133_s0 }
   0x2   :  { %2146 = sst [smem:[#allocation19_spill]] %s2135_s2 }
   0x3   :  { %10 = vsyncpa [#allocation5], 0 }
   0x4   :  { %11 = vsyncpa [#allocation8], 0 }
   0x5   :  { %12 = vsyncpa [#allocation6], 0  ;;  %s1680_s18 = smov 0   ;;  %s1682_s19 = smov 0  }
   0x6   :  { %s1684_s20 = smov 0   ;;  %s1686_s21 = smov 0  }
   0x7   :  { %s1688_s22 = smov 0   ;;  %s1690_s23 = smov 0  }
   0x8 LB: > { %s1709_s24 = sadd.s32 4294967295, %s1636_s23   ;;  %s84_s25 = sadd.s32 1, %s1624_s20  ;;  %s1636_s23 = sphi %s1690_s23, %s18_s23   ;;  %s1632_s22 = sphi %s1688_s22, %s2165_s22   ;;  %s1628_s21 = sphi %s1686_s21, %s2164_s21   ;;  %s1624_s20 = sphi %s1684_s20, %s2163_s20   ;;  %s1620_s19 = sphi %s1682_s19, %s2162_s19   ;;  %s1616_s18 = sphi %s1680_s18, %s2161_s18  }
   0x9   : > { %p91_p0 = scmp.ne.s32.totalorder %s1624_s20, %s1620_s19  ;;  %p92_p1 = scmp.eq.s32.totalorder %s1636_s23, 0 }
   0xa   : > { %p97_p2 = scmp.ne.s32.totalorder %s1620_s19, %s1616_s18  ;;  %p2139_p3 = scmp.eq.s32.totalorder %s1709_s24, 0 }
   0xb   : > { %p93_p4 = por %p92_p1, %p91_p0  ;;  %p1195_p5 = scmp.ge.s32.totalorder %s1636_s23, 1 }
   0xc   : > { %p1720_p6 = por %p2139_p3, %p97_p2  ;;  %p186_p7 = scmp.lt.s32.totalorder %s1636_s23, 3 }
   0xd   : > { %s1638_s28 = smov [#allocation4]   ;;  %p1328_p10 = scmp.lt.s32.totalorder %s1636_s23, 2 }
   0xe   : > { %p1725_p8 = pnand %p1195_p5, %p186_p7  ;;  %s202_s29 = sshll.u32 %s1638_s28, 4  ;;  %s203_s29 = int_to_ptr.vmem [resolvable:$true] %s202_s29 }
   0xf   : > { %p1738_p12 = pnand %p1328_p10, %p93_p4  ;;  %s27_s7 = sadd.s32 1, %s1632_s22 }
  0x10   : > { %p1309_p9 = pneg %p1725_p8  ;;  %s1425_s8 = scalar_lea.vmem %s203_s29, 1024 }
  0x11   : > { %p1426_p0 = scmp.ne.s32.totalorder %s203_s29, %s1425_s8  ;;  %p1433_p5 = scmp.lt.s32.totalorder %s203_s29, %s203_s29 }
  0x12   : > { %p1734_p11 = pnand %p1309_p9, %p2139_p3  ;;  %p1434_p7 = scmp.lt.s32.totalorder %s1425_s8, %s1425_s8 }
  0x14   : > { %p1416_p13 = pneg %p1734_p11  ;;  %p1435_p9 = por %p1434_p7, %p1433_p5 }
  0x16   : > { %p1428_p1 = pnand %p1426_p0, %p1416_p13 }
  0x18   : > { %p1429_p2 = pneg %p1428_p1 }
  0x1a   : > { %p1436_p3 = pnand %p1435_p9, %p1429_p2 }
  0x1c   : > { %1439 = shalt.err (!%p1436_p3)
}
  0x1d   : > { %s2140_s9 = smov 256   ;;  %s2142_s10 = smov 16  }
  0x1e   : > { %s2151_s0 = sld [smem:[#allocation18_spill]]  ;;  %p28_p4 = scmp.ge.s32.totalorder %s27_s7, 2 }
  0x1f   : > { %s227_s13 = sand.u32 1, %s1636_s23   ;;  %s229_s14 = sand.u32 1, %s1624_s20  }
  0x20   : > { %s2167_s7 = smov (%p28_p4, %s27_s7), 0  ;;  %s1760_s15 = sshll.u32 %s229_s14, 9 }
  0x21   : > { %2152 = sst [smem:[#allocation17_spill]] %s2167_s7  ;;  %s81_s16 = ssub.s32 %s1632_s22, %s2167_s7 }
  0x22   : > { %p82_p3 = scmp.eq.s32.totalorder %s81_s16, 0  ;;  %s1223_s17 = sshll.u32 %s1632_s22, 13 }
  0x23   : > { %s2153_s2 = sld [smem:[#allocation19_spill]]  ;;  %s231_s11 = scalar_lea.vmem [#allocation9], %s1760_s15 }
  0x24   : > { %1312 = dma.hbm_to_vmem [thread:$0]  (!%p1734_p11), %s2151_s0, 1024, %s203_s29, [#allocation5], %s2140_s9, %s2140_s9, %s2142_s10  }
  0x25   : > { %s239_s12 = sshll.u32 %s231_s11, 4  ;;  %s1774_s9 = scalar_lea.sflag [#allocation5], %s227_s13  ;;  %s240_s12 = int_to_ptr.vmem [resolvable:$true] %s239_s12 }
  0x26   : > { %s1772_s29 = scalar_select %p82_p3, %s1624_s20, %s84_s25  }
  0x27   : > { %p1442_p10 = pneg %p1738_p12  ;;  %s1453_s14 = scalar_lea.vmem %s240_s12, 8192 }
  0x28   : > { %p1454_p0 = scmp.ne.s32.totalorder %s240_s12, %s1453_s14  ;;  %s1641_s16 = smov [#allocation9]  }
  0x29   : > { %s238_s8 = scalar_lea.hbm %s2153_s2, %s1223_s17  ;;  %s1458_s10 = sshll.u32 %s1641_s16, 4  ;;  %s1459_s10 = int_to_ptr.vmem [resolvable:$false] %s1458_s10 }
  0x2a   : > { %p1456_p1 = pnand %p1454_p0, %p1442_p10  ;;  %s1460_s18 = scalar_lea.vmem %s1459_s10, 16384 }
  0x2b   : > { %p1461_p5 = scmp.lt.s32.totalorder %s240_s12, %s1459_s10  ;;  %p1462_p7 = scmp.lt.s32.totalorder %s1460_s18, %s1453_s14 }
  0x2c   : > { %p1457_p2 = pneg %p1456_p1 }
  0x2d   : > { %p1463_p9 = por %p1462_p7, %p1461_p5 }
  0x2f   : > { %p1464_p4 = pnand %p1463_p9, %p1457_p2 }
  0x31   : > { %1467 = shalt.err (!%p1464_p4)
}
  0x32   : > { %s2154_s25 = smov 16   ;;  %s2155_s13 = smov 256  }
  0x33   : > { %1319 = dma.hbm_to_vmem [thread:$0]  (!%p1738_p12), %s238_s8, 8192, %s240_s12, %s1774_s9, %s2155_s13, %s2155_s13, %s2154_s25  }
  0x34   : > { %s260_s16 = scalar_lea.hbm %s2136_s3, %s1223_s17  ;;  %s253_s0 = scalar_lea.vmem [#allocation10], %s1760_s15 }
  0x35   : > { %s261_s2 = sshll.u32 %s253_s0, 4  ;;  %s1642_s14 = smov [#allocation10]   ;;  %s262_s2 = int_to_ptr.vmem [resolvable:$true] %s261_s2 }
  0x36   : > { %s1481_s10 = scalar_lea.vmem %s262_s2, 8192  ;;  %s1486_s18 = sshll.u32 %s1642_s14, 4  ;;  %s1487_s18 = int_to_ptr.vmem [resolvable:$false] %s1486_s18 }
  0x37   : > { %p1482_p3 = scmp.ne.s32.totalorder %s262_s2, %s1481_s10  ;;  %s1488_s7 = scalar_lea.vmem %s1487_s18, 16384 }
  0x38   : > { %p1489_p2 = scmp.lt.s32.totalorder %s262_s2, %s1487_s18  ;;  %p1490_p5 = scmp.lt.s32.totalorder %s1488_s7, %s1481_s10 }
  0x39   : > { %p1484_p0 = pnand %p1482_p3, %p1442_p10 }
  0x3a   : > { %p1491_p7 = por %p1490_p5, %p1489_p2 }
  0x3b   : > { %p1485_p1 = pneg %p1484_p0 }
  0x3d   : > { %p1492_p9 = pnand %p1491_p7, %p1485_p1 }
  0x3f   : > { %1495 = shalt.err (!%p1492_p9)
}
  0x40   : > { %1322 = dma.hbm_to_vmem [thread:$0]  (!%p1738_p12), %s260_s16, 8192, %s262_s2, %s1774_s9, %s2155_s13, %s2155_s13, %s2154_s25  }
  0x41   : > { %s1643_s0 = smov [#allocation7]   ;;  %s1226_s8 = sshll.u32 %s1632_s22, 8 }
  0x42   : > { %s216_s17 = sshll.u32 %s1643_s0, 4  ;;  %s217_s17 = int_to_ptr.vmem [resolvable:$true] %s216_s17 }
  0x43   : > { %s1507_s12 = scalar_lea.vmem %s217_s17, 32  ;;  %p1515_p1 = scmp.lt.s32.totalorder %s217_s17, %s217_s17 }
  0x44   : > { %p1508_p4 = scmp.ne.s32.totalorder %s217_s17, %s1507_s12  ;;  %p1516_p2 = scmp.lt.s32.totalorder %s1507_s12, %s1507_s12 }
  0x46   : > { %p1510_p3 = pnand %p1508_p4, %p1416_p13  ;;  %p1517_p5 = por %p1516_p2, %p1515_p1 }
  0x48   : > { %p1511_p0 = pneg %p1510_p3 }
  0x4a   : > { %p1518_p7 = pnand %p1517_p5, %p1511_p0 }
  0x4c   : > { %1521 = shalt.err (!%p1518_p7)
}
  0x4d   : > { %1315 = dma.hbm_to_vmem [thread:$0]  (!%p1734_p11), %s2134_s1, 32, %s217_s17, [#allocation8]  }
  0x4e   : > { %s281_s16 = scalar_lea.hbm %s2137_s4, %s1226_s8  ;;  %s275_s10 = scalar_lea.vmem [#allocation11], %s1760_s15 }
  0x4f   : > { %s282_s14 = sshll.u32 %s275_s10, 4  ;;  %s1644_s30 = smov [#allocation11]   ;;  %s283_s14 = int_to_ptr.vmem [resolvable:$true] %s282_s14 }
  0x50   : > { %s1535_s18 = scalar_lea.vmem %s283_s14, 8192  ;;  %s1540_s0 = sshll.u32 %s1644_s30, 4  ;;  %s1541_s0 = int_to_ptr.vmem [resolvable:$false] %s1540_s0 }
  0x51   : > { %p1536_p13 = scmp.ne.s32.totalorder %s283_s14, %s1535_s18  ;;  %s1542_s12 = scalar_lea.vmem %s1541_s0, 16384 }
  0x52   : > { %p1543_p3 = scmp.lt.s32.totalorder %s283_s14, %s1541_s0  ;;  %p1544_p0 = scmp.lt.s32.totalorder %s1542_s12, %s1535_s18 }
  0x53   : > { %p1538_p9 = pnand %p1536_p13, %p1442_p10 }
  0x54   : > { %p1545_p11 = por %p1544_p0, %p1543_p3 }
  0x55   : > { %p1539_p4 = pneg %p1538_p9 }
  0x57   : > { %p1546_p1 = pnand %p1545_p11, %p1539_p4 }
  0x59   : > { %1549 = shalt.err (!%p1546_p1)
}
  0x5a   : > { %s1645_s17 = smov 512   ;;  %294 = sbr.rel (%p1725_p8) target bundleno = 877 (0x36d), region = 40 }
  0x5b   : > { %1325 = dma.hbm_to_vmem [thread:$0]  (!%p1738_p12), %s281_s16, 8192, %s283_s14, %s1774_s9, %s1645_s17, %s2155_s13, %s2154_s25  }
  0x5c   : > { %p2156_p10 = scmp.eq.s32.totalorder (!%p1725_p8), %s1709_s24, 0 }
  0x5f   : > { %1599 = dma.done.wait (%p2156_p10), [#allocation5], 1024   ;;  %p2157_p2 = pmov %p2156_p10 }
  0x61   : > { %1601 = vsyncadd (%p2157_p2), [#allocation5], 4294966272  ;;  %p2158_p5 = pmov %p2157_p2 }
  0x62   : > { %p2159_p7 = pmov %p2157_p2 }
  0x63   : > { %1603 = dma.done.wait (%p2158_p5), [#allocation8], 32  }
  0x64   : > { %1605 = vsyncadd (%p2159_p7), [#allocation8], 4294967264  ;;  %s304_s6 = sand.u32 1, %s1709_s24   ;;  %s306_s9 = sand.u32 1, %s1620_s19  }
  0x65   : > { %s1213_s15 = sshll.u32 %s306_s9, 9  ;;  %s305_s27 = scalar_lea.sflag [#allocation5], %s304_s6 }
  0x66   : > { %s1833_s25 = scalar_lea.vmem [#allocation9], %s1213_s15 }
  0x67   : > { %1607 = dma.done.wait (%p1720_p6), %s305_s27, 24576  }
  0x68   : > { %1609 = vsyncadd (%p1720_p6), %s305_s27, 4294942720  ;;  %s1839_s13 = scalar_lea.vmem [#allocation10], %s1213_s15  ;;  %s1841_s8 = scalar_lea.vmem [#allocation11], %s1213_s15 }
  0x69   : > { %p1216_p8 = scmp.ne.s32.totalorder %s1628_s21, 0 }
  0x6b   : > { %366 = sbr.rel (%p1216_p8) target bundleno = 283 (0x11b), region = 64 }
  0x70   : > { %v371_v0 = vld [vmem:[#allocation4 + $0x20] sm:$0xff]  ;;  %v372_v1 = vld [vmem:[#allocation4 + $0x28] sm:$0xff]  ;;  %v1844_v7 = vld [vmem:[#allocation4 + $0x30] sm:$0xff]  ;;  %v1646_v20 = vmov 0.0   ;;  %v418_v28 = vlaneseq }
  0x71   : > { %v367_v2 = vld [vmem:[#allocation4] sm:$0xff]  ;;  %v379_v3 = vmul.f32 %v371_v0, %v371_v0  ;;  %v380_v4 = vmul.f32 %v372_v1, %v372_v1  ;;  %v368_v5 = vld [vmem:[#allocation4 + $0x8] sm:$0xff]  ;;  %v1846_v8 = vld [vmem:[#allocation4 + $0x38] sm:$0xff]  ;;  %v381_v10 = vmul.f32 %v1844_v7, %v1844_v7  ;;  %444 = vst [vmem:[#allocation3] sm:$0xff] %v1646_v20 }
  0x72   : > { %v375_v6 = vmul.f32 %v367_v2, %v367_v2  ;;  %v376_v9 = vmul.f32 %v368_v5, %v368_v5  ;;  %v382_v11 = vmul.f32 %v1846_v8, %v1846_v8  ;;  %v369_v12 = vld [vmem:[#allocation4 + $0x10] sm:$0xff]  ;;  %v370_v13 = vld [vmem:[#allocation4 + $0x18] sm:$0xff]  ;;  %445 = vst [vmem:[#allocation3 + $0x18] sm:$0xff] %v1646_v20  ;;  %446 = vst [vmem:[#allocation3 + $0x10] sm:$0xff] %v1646_v20  ;;  %v419_v34 = vshrl.u32 %v418_v28, 7 }
  0x73   : > { %v389_v14 = vadd.f32 %v380_v4, %v379_v3  ;;  %v377_v15 = vmul.f32 %v369_v12, %v369_v12  ;;  %v378_v16 = vmul.f32 %v370_v13, %v370_v13  ;;  %447 = vst [vmem:[#allocation3 + $0x20] sm:$0xff] %v1646_v20  ;;  %448 = vst [vmem:[#allocation3 + $0x28] sm:$0xff] %v1646_v20  ;;  %v416_v37 = vld [vmem:[#allocation7] sm:$0x3] }
  0x74   : > { %v383_v17 = vadd.f32 %v376_v9, %v375_v6  ;;  %v392_v18 = vadd.f32 %v382_v11, %v381_v10  ;;  %449 = vst [vmem:[#allocation3 + $0x8] sm:$0xff] %v1646_v20  ;;  %450 = vst [vmem:[#allocation3 + $0x30] sm:$0xff] %v1646_v20  ;;  %v420_v35 = vsub.s32 0, %v419_v34  ;;  %v424_v36 = vsub.s32 1, %v419_v34 }
  0x75   : > { %390 = vadd.xlane.f32.xlu1 %v389_v14  ;;  %v386_v19 = vadd.f32 %v378_v16, %v377_v15  ;;  %451 = vst [vmem:[#allocation3 + $0x38] sm:$0xff] %v1646_v20 }
  0x76   : > { %384 = vadd.xlane.f32.xlu0 %v383_v17  ;;  %v421_v38 = vrot.slane %v416_v37, %v420_v35  ;;  %v425_v39 = vrot.slane %v416_v37, %v424_v36 }
  0x79   : > { %393 = vadd.xlane.f32.xlu1 %v392_v18 }
  0x7a   : > { %387 = vadd.xlane.f32.xlu0 %v386_v19 }
  0xfe   : > { %v391_v21 = vpop.xlane.xlu1 %390 }
  0xff   : > { %v398_v22 = vmul.f32 0.00390625, %v391_v21  ;;  %v385_v23 = vpop.xlane.xlu0 %384 }
 0x100   : > { %v396_v24 = vmul.f32 0.00390625, %v385_v23 }
 0x101   : > { %v402_v25 = vadd.f32 1e-06, %v398_v22 }
 0x102   : > { %v400_v26 = vadd.f32 1e-06, %v396_v24  ;;  %v394_v27 = vpop.xlane.xlu1 %393 }
 0x103   : > { %1390 = vrsqrt.f32 %v402_v25  ;;  %v399_v29 = vmul.f32 0.00390625, %v394_v27  ;;  %v388_v30 = vpop.xlane.xlu0 %387 }
 0x104   : > { %1392 = vrsqrt.f32 %v400_v26  ;;  %v397_v31 = vmul.f32 0.00390625, %v388_v30 }
 0x105   : > { %v403_v32 = vadd.f32 1e-06, %v399_v29 }
 0x106   : > { %v401_v33 = vadd.f32 1e-06, %v397_v31 }
 0x107   : > { %1394 = vrsqrt.f32 %v403_v32 }
 0x108   : > { %1396 = vrsqrt.f32 %v401_v33 }
 0x110   : > { %v1391_v40 = vpop.eup %1390 }
 0x111   : > { %v1393_v41 = vpop.eup %1392  ;;  %v412_v42 = vmul.f32 %v1391_v40, %v371_v0  ;;  %v413_v43 = vmul.f32 %v1391_v40, %v372_v1 }
 0x112   : > { %v408_v44 = vmul.f32 %v1393_v41, %v367_v2  ;;  %v409_v45 = vmul.f32 %v1393_v41, %v368_v5 }
 0x113   : > { %v432_v46 = vmul.f32 %v421_v38, %v412_v42  ;;  %v433_v47 = vmul.f32 %v425_v39, %v413_v43 }
 0x114   : > { %v1395_v48 = vpop.eup %1394  ;;  %v428_v49 = vmul.f32 %v421_v38, %v408_v44  ;;  %v429_v50 = vmul.f32 %v425_v39, %v409_v45 }
 0x115   : > { %v1397_v51 = vpop.eup %1396  ;;  %440 = vst [vmem:[#allocation2 + $0x8] sm:$0xff] %v432_v46  ;;  %441 = vst [vmem:[#allocation2 + $0x20] sm:$0xff] %v433_v47  ;;  %v414_v52 = vmul.f32 %v1395_v48, %v1844_v7  ;;  %v415_v53 = vmul.f32 %v1395_v48, %v1846_v8 }
 0x116   : > { %436 = vst [vmem:[#allocation2 + $0x30] sm:$0xff] %v428_v49  ;;  %437 = vst [vmem:[#allocation2] sm:$0xff] %v429_v50  ;;  %v410_v54 = vmul.f32 %v1397_v51, %v369_v12  ;;  %v411_v55 = vmul.f32 %v1397_v51, %v370_v13 }
 0x117   : > { %v434_v56 = vmul.f32 %v421_v38, %v414_v52  ;;  %v435_v57 = vmul.f32 %v425_v39, %v415_v53 }
 0x118   : > { %v430_v58 = vmul.f32 %v421_v38, %v410_v54  ;;  %v431_v59 = vmul.f32 %v425_v39, %v411_v55 }
 0x119   : > { %442 = vst [vmem:[#allocation2 + $0x28] sm:$0xff] %v434_v56  ;;  %443 = vst [vmem:[#allocation2 + $0x38] sm:$0xff] %v435_v57 }
 0x11a   : > { %438 = vst [vmem:[#allocation2 + $0x18] sm:$0xff] %v430_v58  ;;  %439 = vst [vmem:[#allocation2 + $0x10] sm:$0xff] %v431_v59 }
 0x11b PF: > { %v644_v60 = vld [vmem:[%s1833_s25 + $0xf8] sm:$0xff]  ;;  %v643_v61 = vld [vmem:[%s1833_s25 + $0xf0] sm:$0xff]  ;;  %v642_v62 = vld [vmem:[%s1833_s25 + $0xe8] sm:$0xff]  ;;  %p1217_p6 = scmp.ne.s32.totalorder %s1628_s21, 1 }
 0x11c   : > { %677 = vmatprep.subr.mxu1 %v644_v60  ;;  %v641_v63 = vld [vmem:[%s1833_s25 + $0xe0] sm:$0xff]  ;;  %v640_v0 = vld [vmem:[%s1833_s25 + $0xd8] sm:$0xff]  ;;  %v490_v2 = vld [vmem:[%s1839_s13 + $0xf0] sm:$0xff] }
 0x11d   : > { %678 = vmatpush1.xpose.msra.mxu1 %v643_v61  ;;  %v491_v1 = vld [vmem:[%s1839_s13 + $0xf8] sm:$0xff]  ;;  %v489_v3 = vld [vmem:[%s1839_s13 + $0xe8] sm:$0xff]  ;;  %v639_v4 = vld [vmem:[%s1833_s25 + $0xd0] sm:$0xff] }
 0x11e   : > { %679 = vmatprep.subr.mxu1 %v642_v62  ;;  %524 = vmatprep.subr.mxu0 %v491_v1  ;;  %v488_v5 = vld [vmem:[%s1839_s13 + $0xe0] sm:$0xff]  ;;  %v638_v6 = vld [vmem:[%s1833_s25 + $0xc8] sm:$0xff]  ;;  %v487_v7 = vld [vmem:[%s1839_s13 + $0xd8] sm:$0xff] }
 0x11f   : > { %525 = vmatpush1.xpose.msra.mxu0 %v490_v2  ;;  %v637_v8 = vld [vmem:[%s1833_s25 + $0xc0] sm:$0xff]  ;;  %v486_v9 = vld [vmem:[%s1839_s13 + $0xd0] sm:$0xff]  ;;  %v636_v10 = vld [vmem:[%s1833_s25 + $0xb8] sm:$0xff] }
 0x120   : > { %526 = vmatprep.subr.mxu0 %v489_v3  ;;  %v485_v11 = vld [vmem:[%s1839_s13 + $0xc8] sm:$0xff]  ;;  %v635_v12 = vld [vmem:[%s1833_s25 + $0xb0] sm:$0xff]  ;;  %v484_v13 = vld [vmem:[%s1839_s13 + $0xc0] sm:$0xff] }
 0x121   : > { %680 = vmatpush1.xpose.msra.mxu1 %v641_v63  ;;  %v634_v14 = vld [vmem:[%s1833_s25 + $0xa8] sm:$0xff]  ;;  %v483_v15 = vld [vmem:[%s1839_s13 + $0xb8] sm:$0xff]  ;;  %v633_v16 = vld [vmem:[%s1833_s25 + $0xa0] sm:$0xff] }
 0x122   : > { %681 = vmatprep.subr.mxu1 %v640_v0  ;;  %v482_v17 = vld [vmem:[%s1839_s13 + $0xb0] sm:$0xff]  ;;  %v632_v18 = vld [vmem:[%s1833_s25 + $0x98] sm:$0xff]  ;;  %v481_v19 = vld [vmem:[%s1839_s13 + $0xa8] sm:$0xff] }
 0x123   : > { %527 = vmatpush1.xpose.msra.mxu0 %v488_v5  ;;  %v631_v20 = vld [vmem:[%s1833_s25 + $0x90] sm:$0xff]  ;;  %v480_v21 = vld [vmem:[%s1839_s13 + $0xa0] sm:$0xff]  ;;  %v630_v22 = vld [vmem:[%s1833_s25 + $0x88] sm:$0xff] }
 0x124   : > { %528 = vmatprep.subr.mxu0 %v487_v7  ;;  %v479_v23 = vld [vmem:[%s1839_s13 + $0x98] sm:$0xff]  ;;  %v629_v24 = vld [vmem:[%s1833_s25 + $0x80] sm:$0xff]  ;;  %v478_v25 = vld [vmem:[%s1839_s13 + $0x90] sm:$0xff] }
 0x125   : > { %682 = vmatpush1.xpose.msra.mxu1 %v639_v4  ;;  %v628_v26 = vld [vmem:[%s1833_s25 + $0x78] sm:$0xff]  ;;  %v477_v27 = vld [vmem:[%s1839_s13 + $0x88] sm:$0xff]  ;;  %v627_v28 = vld [vmem:[%s1833_s25 + $0x70] sm:$0xff] }
 0x126   : > { %683 = vmatprep.subr.mxu1 %v638_v6  ;;  %v476_v29 = vld [vmem:[%s1839_s13 + $0x80] sm:$0xff]  ;;  %v626_v30 = vld [vmem:[%s1833_s25 + $0x68] sm:$0xff]  ;;  %v475_v31 = vld [vmem:[%s1839_s13 + $0x78] sm:$0xff] }
 0x127   : > { %529 = vmatpush1.xpose.msra.mxu0 %v486_v9  ;;  %v625_v32 = vld [vmem:[%s1833_s25 + $0x60] sm:$0xff]  ;;  %v474_v33 = vld [vmem:[%s1839_s13 + $0x70] sm:$0xff]  ;;  %v624_v34 = vld [vmem:[%s1833_s25 + $0x58] sm:$0xff] }
 0x128   : > { %530 = vmatprep.subr.mxu0 %v485_v11  ;;  %v473_v35 = vld [vmem:[%s1839_s13 + $0x68] sm:$0xff]  ;;  %v453_v36 = vld [vmem:[#allocation2] sm:$0xff]  ;;  %v623_v37 = vld [vmem:[%s1833_s25 + $0x50] sm:$0xff] }
 0x129   : > { %684 = vmatpush1.xpose.msra.mxu1 %v637_v8  ;;  %v472_v38 = vld [vmem:[%s1839_s13 + $0x60] sm:$0xff]  ;;  %v622_v39 = vld [vmem:[%s1833_s25 + $0x48] sm:$0xff]  ;;  %v471_v40 = vld [vmem:[%s1839_s13 + $0x58] sm:$0xff]  ;;  %741 = vmatprep.mubr.f32.mxu1 %v453_v36 }
 0x12a   : > { %685 = vmatprep.subr.mxu1 %v636_v10  ;;  %588 = vmatprep.mubr.f32.mxu0 %v453_v36  ;;  %v621_v41 = vld [vmem:[%s1833_s25 + $0x40] sm:$0xff]  ;;  %v470_v42 = vld [vmem:[%s1839_s13 + $0x50] sm:$0xff]  ;;  %v620_v43 = vld [vmem:[%s1833_s25 + $0x38] sm:$0xff] }
 0x12b   : > { %531 = vmatpush1.xpose.msra.mxu0 %v484_v13  ;;  %v469_v44 = vld [vmem:[%s1839_s13 + $0x48] sm:$0xff]  ;;  %v619_v45 = vld [vmem:[%s1833_s25 + $0x30] sm:$0xff]  ;;  %v468_v46 = vld [vmem:[%s1839_s13 + $0x40] sm:$0xff] }
 0x12c   : > { %532 = vmatprep.subr.mxu0 %v483_v15  ;;  %v618_v47 = vld [vmem:[%s1833_s25 + $0x28] sm:$0xff]  ;;  %v467_v48 = vld [vmem:[%s1839_s13 + $0x38] sm:$0xff]  ;;  %v617_v49 = vld [vmem:[%s1833_s25 + $0x20] sm:$0xff] }
 0x12d   : > { %686 = vmatpush1.xpose.msra.mxu1 %v635_v12  ;;  %v466_v50 = vld [vmem:[%s1839_s13 + $0x30] sm:$0xff]  ;;  %v616_v51 = vld [vmem:[%s1833_s25 + $0x18] sm:$0xff]  ;;  %v465_v52 = vld [vmem:[%s1839_s13 + $0x28] sm:$0xff] }
 0x12e   : > { %687 = vmatprep.subr.mxu1 %v634_v14  ;;  %v615_v53 = vld [vmem:[%s1833_s25 + $0x10] sm:$0xff]  ;;  %v464_v54 = vld [vmem:[%s1839_s13 + $0x20] sm:$0xff]  ;;  %v614_v55 = vld [vmem:[%s1833_s25 + $0x8] sm:$0xff] }
 0x12f   : > { %533 = vmatpush1.xpose.msra.mxu0 %v482_v17  ;;  %v463_v56 = vld [vmem:[%s1839_s13 + $0x18] sm:$0xff]  ;;  %v613_v57 = vld [vmem:[%s1833_s25] sm:$0xff]  ;;  %v462_v58 = vld [vmem:[%s1839_s13 + $0x10] sm:$0xff] }
 0x130   : > { %534 = vmatprep.subr.mxu0 %v481_v19  ;;  %v676_v59 = vld [vmem:[%s1833_s25 + $0x1f8] sm:$0xff]  ;;  %v461_v60 = vld [vmem:[%s1839_s13 + $0x8] sm:$0xff]  ;;  %v675_v61 = vld [vmem:[%s1833_s25 + $0x1f0] sm:$0xff] }
 0x131   : > { %688 = vmatpush1.xpose.msra.mxu1 %v633_v16  ;;  %v460_v62 = vld [vmem:[%s1839_s13] sm:$0xff]  ;;  %v674_v63 = vld [vmem:[%s1833_s25 + $0x1e8] sm:$0xff]  ;;  %v523_v0 = vld [vmem:[%s1839_s13 + $0x1f8] sm:$0xff] }
 0x132   : > { %689 = vmatprep.subr.mxu1 %v632_v18  ;;  %v673_v1 = vld [vmem:[%s1833_s25 + $0x1e0] sm:$0xff]  ;;  %v522_v2 = vld [vmem:[%s1839_s13 + $0x1f0] sm:$0xff]  ;;  %v672_v3 = vld [vmem:[%s1833_s25 + $0x1d8] sm:$0xff] }
 0x133   : > { %535 = vmatpush1.xpose.msra.mxu0 %v480_v21  ;;  %v521_v4 = vld [vmem:[%s1839_s13 + $0x1e8] sm:$0xff]  ;;  %v671_v5 = vld [vmem:[%s1833_s25 + $0x1d0] sm:$0xff]  ;;  %v520_v6 = vld [vmem:[%s1839_s13 + $0x1e0] sm:$0xff] }
 0x134   : > { %536 = vmatprep.subr.mxu0 %v479_v23  ;;  %v670_v7 = vld [vmem:[%s1833_s25 + $0x1c8] sm:$0xff]  ;;  %v519_v8 = vld [vmem:[%s1839_s13 + $0x1d8] sm:$0xff]  ;;  %v669_v9 = vld [vmem:[%s1833_s25 + $0x1c0] sm:$0xff] }
 0x135   : > { %690 = vmatpush1.xpose.msra.mxu1 %v631_v20  ;;  %v518_v10 = vld [vmem:[%s1839_s13 + $0x1d0] sm:$0xff]  ;;  %v668_v11 = vld [vmem:[%s1833_s25 + $0x1b8] sm:$0xff]  ;;  %v517_v12 = vld [vmem:[%s1839_s13 + $0x1c8] sm:$0xff] }
 0x136   : > { %691 = vmatprep.subr.mxu1 %v630_v22  ;;  %v667_v13 = vld [vmem:[%s1833_s25 + $0x1b0] sm:$0xff]  ;;  %v516_v14 = vld [vmem:[%s1839_s13 + $0x1c0] sm:$0xff]  ;;  %v666_v15 = vld [vmem:[%s1833_s25 + $0x1a8] sm:$0xff] }
 0x137   : > { %537 = vmatpush1.xpose.msra.mxu0 %v478_v25  ;;  %v515_v16 = vld [vmem:[%s1839_s13 + $0x1b8] sm:$0xff]  ;;  %v665_v17 = vld [vmem:[%s1833_s25 + $0x1a0] sm:$0xff]  ;;  %v514_v18 = vld [vmem:[%s1839_s13 + $0x1b0] sm:$0xff] }
 0x138   : > { %538 = vmatprep.subr.mxu0 %v477_v27  ;;  %v664_v19 = vld [vmem:[%s1833_s25 + $0x198] sm:$0xff]  ;;  %v513_v20 = vld [vmem:[%s1839_s13 + $0x1a8] sm:$0xff]  ;;  %v663_v21 = vld [vmem:[%s1833_s25 + $0x190] sm:$0xff] }
 0x139   : > { %692 = vmatpush1.xpose.msra.mxu1 %v629_v24  ;;  %v512_v22 = vld [vmem:[%s1839_s13 + $0x1a0] sm:$0xff]  ;;  %v662_v23 = vld [vmem:[%s1833_s25 + $0x188] sm:$0xff]  ;;  %v511_v24 = vld [vmem:[%s1839_s13 + $0x198] sm:$0xff] }
 0x13a   : > { %693 = vmatprep.subr.mxu1 %v628_v26  ;;  %v661_v25 = vld [vmem:[%s1833_s25 + $0x180] sm:$0xff]  ;;  %v510_v26 = vld [vmem:[%s1839_s13 + $0x190] sm:$0xff]  ;;  %v660_v27 = vld [vmem:[%s1833_s25 + $0x178] sm:$0xff] }
 0x13b   : > { %539 = vmatpush1.xpose.msra.mxu0 %v476_v29  ;;  %v659_v29 = vld [vmem:[%s1833_s25 + $0x170] sm:$0xff]  ;;  %v505_v36 = vld [vmem:[%s1839_s13 + $0x168] sm:$0xff] }
 0x13c   : > { %540 = vmatprep.subr.mxu0 %v475_v31  ;;  %v658_v31 = vld [vmem:[%s1833_s25 + $0x168] sm:$0xff] }
 0x13d   : > { %694 = vmatpush1.xpose.msra.mxu1 %v627_v28  ;;  %v509_v28 = vld [vmem:[%s1839_s13 + $0x188] sm:$0xff] }
 0x13e   : > { %695 = vmatprep.subr.mxu1 %v626_v30  ;;  %v508_v30 = vld [vmem:[%s1839_s13 + $0x180] sm:$0xff] }
 0x13f   : > { %541 = vmatpush1.xpose.msra.mxu0 %v474_v33  ;;  %v657_v33 = vld [vmem:[%s1833_s25 + $0x160] sm:$0xff] }
 0x140   : > { %542 = vmatprep.subr.mxu0 %v473_v35  ;;  %v656_v35 = vld [vmem:[%s1833_s25 + $0x158] sm:$0xff] }
 0x141   : > { %696 = vmatpush1.xpose.msra.mxu1 %v625_v32  ;;  %v507_v32 = vld [vmem:[%s1839_s13 + $0x178] sm:$0xff] }
 0x142   : > { %697 = vmatprep.subr.mxu1 %v624_v34  ;;  %v506_v34 = vld [vmem:[%s1839_s13 + $0x170] sm:$0xff] }
 0x143   : > { %543 = vmatpush1.xpose.msra.mxu0 %v472_v38  ;;  %v504_v38 = vld [vmem:[%s1839_s13 + $0x160] sm:$0xff] }
 0x144   : > { %544 = vmatprep.subr.mxu0 %v471_v40  ;;  %v503_v40 = vld [vmem:[%s1839_s13 + $0x158] sm:$0xff] }
 0x145   : > { %698 = vmatpush1.xpose.msra.mxu1 %v623_v37  ;;  %v655_v37 = vld [vmem:[%s1833_s25 + $0x150] sm:$0xff] }
 0x146   : > { %699 = vmatprep.subr.mxu1 %v622_v39  ;;  %v654_v39 = vld [vmem:[%s1833_s25 + $0x148] sm:$0xff] }
 0x147   : > { %545 = vmatpush1.xpose.msra.mxu0 %v470_v42  ;;  %v502_v42 = vld [vmem:[%s1839_s13 + $0x150] sm:$0xff] }
 0x148   : > { %546 = vmatprep.subr.mxu0 %v469_v44  ;;  %v501_v44 = vld [vmem:[%s1839_s13 + $0x148] sm:$0xff] }
 0x149   : > { %700 = vmatpush1.xpose.msra.mxu1 %v621_v41  ;;  %v653_v41 = vld [vmem:[%s1833_s25 + $0x140] sm:$0xff] }
 0x14a   : > { %701 = vmatprep.subr.mxu1 %v620_v43  ;;  %v652_v43 = vld [vmem:[%s1833_s25 + $0x138] sm:$0xff] }
 0x14b   : > { %547 = vmatpush1.xpose.msra.mxu0 %v468_v46  ;;  %v500_v46 = vld [vmem:[%s1839_s13 + $0x140] sm:$0xff] }
 0x14c   : > { %548 = vmatprep.subr.mxu0 %v467_v48  ;;  %v499_v48 = vld [vmem:[%s1839_s13 + $0x138] sm:$0xff] }
 0x14d   : > { %702 = vmatpush1.xpose.msra.mxu1 %v619_v45  ;;  %v651_v45 = vld [vmem:[%s1833_s25 + $0x130] sm:$0xff] }
 0x14e   : > { %703 = vmatprep.subr.mxu1 %v618_v47  ;;  %v650_v47 = vld [vmem:[%s1833_s25 + $0x128] sm:$0xff] }
 0x14f   : > { %549 = vmatpush1.xpose.msra.mxu0 %v466_v50  ;;  %v498_v50 = vld [vmem:[%s1839_s13 + $0x130] sm:$0xff] }
 0x150   : > { %550 = vmatprep.subr.mxu0 %v465_v52  ;;  %v497_v52 = vld [vmem:[%s1839_s13 + $0x128] sm:$0xff] }
 0x151   : > { %704 = vmatpush1.xpose.msra.mxu1 %v617_v49  ;;  %v649_v49 = vld [vmem:[%s1833_s25 + $0x120] sm:$0xff] }
 0x152   : > { %705 = vmatprep.subr.mxu1 %v616_v51  ;;  %v648_v51 = vld [vmem:[%s1833_s25 + $0x118] sm:$0xff] }
 0x153   : > { %551 = vmatpush1.xpose.msra.mxu0 %v464_v54  ;;  %v496_v54 = vld [vmem:[%s1839_s13 + $0x120] sm:$0xff] }
 0x154   : > { %552 = vmatprep.subr.mxu0 %v463_v56  ;;  %v495_v56 = vld [vmem:[%s1839_s13 + $0x118] sm:$0xff] }
 0x155   : > { %706 = vmatpush1.xpose.msra.mxu1 %v615_v53  ;;  %v647_v53 = vld [vmem:[%s1833_s25 + $0x110] sm:$0xff] }
 0x156   : > { %707 = vmatprep.subr.mxu1 %v614_v55  ;;  %v646_v55 = vld [vmem:[%s1833_s25 + $0x108] sm:$0xff] }
 0x157   : > { %553 = vmatpush1.xpose.msra.mxu0 %v462_v58  ;;  %v494_v58 = vld [vmem:[%s1839_s13 + $0x110] sm:$0xff] }
 0x158   : > { %554 = vmatprep.subr.mxu0 %v461_v60  ;;  %v452_v60 = vld [vmem:[#allocation2 + $0x30] sm:$0xff] }
 0x159   : > { %708 = vmatpush1.xpose.msra.mxu1 %v613_v57  ;;  %v645_v57 = vld [vmem:[%s1833_s25 + $0x100] sm:$0xff] }
 0x15a   : > { %709 = vmatprep.subr.mxu1 %v676_v59  ;;  %v493_v59 = vld [vmem:[%s1839_s13 + $0x108] sm:$0xff] }
 0x15b   : > { %555 = vmatpush1.xpose.msra.mxu0 %v460_v62  ;;  %v455_v62 = vld [vmem:[#allocation2 + $0x10] sm:$0xff] }
 0x15c   : > { %556 = vmatprep.subr.mxu0 %v523_v0  ;;  %v454_v0 = vld [vmem:[#allocation2 + $0x18] sm:$0xff] }
 0x15d   : > { %710 = vmatpush2.xpose.msra.mxu1 %v675_v61  ;;  %v885_v61 = vld [vmem:[%s1841_s8 + $0xf8] sm:$0xff] }
 0x15e   : > { %711 = vmatprep.subr.mxu1 %v674_v63  ;;  %v492_v63 = vld [vmem:[%s1839_s13 + $0x100] sm:$0xff] }
 0x15f   : > { %557 = vmatpush2.xpose.msra.mxu0 %v522_v2  ;;  %v457_v2 = vld [vmem:[#allocation2 + $0x20] sm:$0xff] }
 0x160   : > { %558 = vmatprep.subr.mxu0 %v521_v4  ;;  %v456_v4 = vld [vmem:[#allocation2 + $0x8] sm:$0xff] }
 0x161   : > { %712 = vmatpush2.xpose.msra.mxu1 %v673_v1  ;;  %v884_v1 = vld [vmem:[%s1841_s8 + $0xf0] sm:$0xff] }
 0x162   : > { %713 = vmatprep.subr.mxu1 %v672_v3  ;;  %v883_v3 = vld [vmem:[%s1841_s8 + $0xe8] sm:$0xff] }
 0x163   : > { %559 = vmatpush2.xpose.msra.mxu0 %v520_v6  ;;  %v459_v6 = vld [vmem:[#allocation2 + $0x38] sm:$0xff] }
 0x164   : > { %560 = vmatprep.subr.mxu0 %v519_v8  ;;  %v458_v8 = vld [vmem:[#allocation2 + $0x28] sm:$0xff] }
 0x165   : > { %714 = vmatpush2.xpose.msra.mxu1 %v671_v5  ;;  %v882_v5 = vld [vmem:[%s1841_s8 + $0xe0] sm:$0xff] }
 0x166   : > { %715 = vmatprep.subr.mxu1 %v670_v7  ;;  %v881_v7 = vld [vmem:[%s1841_s8 + $0xd8] sm:$0xff] }
 0x167   : > { %561 = vmatpush2.xpose.msra.mxu0 %v518_v10  ;;  %v879_v10 = vld [vmem:[%s1841_s8 + $0xc8] sm:$0xff] }
 0x168   : > { %562 = vmatprep.subr.mxu0 %v517_v12  ;;  %v877_v12 = vld [vmem:[%s1841_s8 + $0xb8] sm:$0xff] }
 0x169   : > { %716 = vmatpush2.xpose.msra.mxu1 %v669_v9  ;;  %v880_v9 = vld [vmem:[%s1841_s8 + $0xd0] sm:$0xff] }
 0x16a   : > { %717 = vmatprep.subr.mxu1 %v668_v11  ;;  %v878_v11 = vld [vmem:[%s1841_s8 + $0xc0] sm:$0xff] }
 0x16b   : > { %563 = vmatpush2.xpose.msra.mxu0 %v516_v14  ;;  %v875_v14 = vld [vmem:[%s1841_s8 + $0xa8] sm:$0xff] }
 0x16c   : > { %564 = vmatprep.subr.mxu0 %v515_v16  ;;  %v873_v16 = vld [vmem:[%s1841_s8 + $0x98] sm:$0xff] }
 0x16d   : > { %718 = vmatpush2.xpose.msra.mxu1 %v667_v13  ;;  %v876_v13 = vld [vmem:[%s1841_s8 + $0xb0] sm:$0xff] }
 0x16e   : > { %719 = vmatprep.subr.mxu1 %v666_v15  ;;  %v874_v15 = vld [vmem:[%s1841_s8 + $0xa0] sm:$0xff] }
 0x16f   : > { %565 = vmatpush2.xpose.msra.mxu0 %v514_v18  ;;  %v871_v18 = vld [vmem:[%s1841_s8 + $0x88] sm:$0xff] }
 0x170   : > { %566 = vmatprep.subr.mxu0 %v513_v20  ;;  %v869_v20 = vld [vmem:[%s1841_s8 + $0x78] sm:$0xff] }
 0x171   : > { %720 = vmatpush2.xpose.msra.mxu1 %v665_v17  ;;  %v872_v17 = vld [vmem:[%s1841_s8 + $0x90] sm:$0xff] }
 0x172   : > { %721 = vmatprep.subr.mxu1 %v664_v19  ;;  %v870_v19 = vld [vmem:[%s1841_s8 + $0x80] sm:$0xff] }
 0x173   : > { %567 = vmatpush2.xpose.msra.mxu0 %v512_v22  ;;  %v867_v22 = vld [vmem:[%s1841_s8 + $0x68] sm:$0xff] }
 0x174   : > { %568 = vmatprep.subr.mxu0 %v511_v24  ;;  %v865_v24 = vld [vmem:[%s1841_s8 + $0x58] sm:$0xff] }
 0x175   : > { %722 = vmatpush2.xpose.msra.mxu1 %v663_v21  ;;  %v868_v21 = vld [vmem:[%s1841_s8 + $0x70] sm:$0xff] }
 0x176   : > { %723 = vmatprep.subr.mxu1 %v662_v23  ;;  %v866_v23 = vld [vmem:[%s1841_s8 + $0x60] sm:$0xff] }
 0x177   : > { %569 = vmatpush2.xpose.msra.mxu0 %v510_v26  ;;  %v863_v26 = vld [vmem:[%s1841_s8 + $0x48] sm:$0xff] }
 0x178   : > { %570 = vmatprep.subr.mxu0 %v509_v28  ;;  %v861_v28 = vld [vmem:[%s1841_s8 + $0x38] sm:$0xff] }
 0x179   : > { %724 = vmatpush2.xpose.msra.mxu1 %v661_v25  ;;  %v864_v25 = vld [vmem:[%s1841_s8 + $0x50] sm:$0xff] }
 0x17a   : > { %725 = vmatprep.subr.mxu1 %v660_v27  ;;  %v862_v27 = vld [vmem:[%s1841_s8 + $0x40] sm:$0xff] }
 0x17b   : > { %571 = vmatpush2.xpose.msra.mxu0 %v508_v30  ;;  %v859_v30 = vld [vmem:[%s1841_s8 + $0x28] sm:$0xff] }
 0x17c   : > { %572 = vmatprep.subr.mxu0 %v507_v32  ;;  %v857_v32 = vld [vmem:[%s1841_s8 + $0x18] sm:$0xff] }
 0x17d   : > { %726 = vmatpush2.xpose.msra.mxu1 %v659_v29  ;;  %v860_v29 = vld [vmem:[%s1841_s8 + $0x30] sm:$0xff] }
 0x17e   : > { %727 = vmatprep.subr.mxu1 %v658_v31  ;;  %v858_v31 = vld [vmem:[%s1841_s8 + $0x20] sm:$0xff] }
 0x17f   : > { %573 = vmatpush2.xpose.msra.mxu0 %v506_v34  ;;  %v855_v34 = vld [vmem:[%s1841_s8 + $0x8] sm:$0xff] }
 0x180   : > { %574 = vmatprep.subr.mxu0 %v505_v36  ;;  %v917_v36 = vld [vmem:[%s1841_s8 + $0x1f8] sm:$0xff] }
 0x181   : > { %728 = vmatpush2.xpose.msra.mxu1 %v657_v33  ;;  %v856_v33 = vld [vmem:[%s1841_s8 + $0x10] sm:$0xff] }
 0x182   : > { %729 = vmatprep.subr.mxu1 %v656_v35  ;;  %v854_v35 = vld [vmem:[%s1841_s8] sm:$0xff] }
 0x183   : > { %575 = vmatpush2.xpose.msra.mxu0 %v504_v38  ;;  %v915_v38 = vld [vmem:[%s1841_s8 + $0x1e8] sm:$0xff] }
 0x184   : > { %576 = vmatprep.subr.mxu0 %v503_v40  ;;  %v913_v40 = vld [vmem:[%s1841_s8 + $0x1d8] sm:$0xff] }
 0x185   : > { %730 = vmatpush2.xpose.msra.mxu1 %v655_v37  ;;  %v916_v37 = vld [vmem:[%s1841_s8 + $0x1f0] sm:$0xff] }
 0x186   : > { %731 = vmatprep.subr.mxu1 %v654_v39  ;;  %v914_v39 = vld [vmem:[%s1841_s8 + $0x1e0] sm:$0xff] }
 0x187   : > { %577 = vmatpush2.xpose.msra.mxu0 %v502_v42  ;;  %v911_v42 = vld [vmem:[%s1841_s8 + $0x1c8] sm:$0xff] }
 0x188   : > { %578 = vmatprep.subr.mxu0 %v501_v44  ;;  %v909_v44 = vld [vmem:[%s1841_s8 + $0x1b8] sm:$0xff] }
 0x189   : > { %732 = vmatpush2.xpose.msra.mxu1 %v653_v41  ;;  %v912_v41 = vld [vmem:[%s1841_s8 + $0x1d0] sm:$0xff] }
 0x18a   : > { %733 = vmatprep.subr.mxu1 %v652_v43  ;;  %v910_v43 = vld [vmem:[%s1841_s8 + $0x1c0] sm:$0xff] }
 0x18b   : > { %579 = vmatpush2.xpose.msra.mxu0 %v500_v46  ;;  %v907_v46 = vld [vmem:[%s1841_s8 + $0x1a8] sm:$0xff] }
 0x18c   : > { %580 = vmatprep.subr.mxu0 %v499_v48  ;;  %v905_v48 = vld [vmem:[%s1841_s8 + $0x198] sm:$0xff] }
 0x18d   : > { %734 = vmatpush2.xpose.msra.mxu1 %v651_v45  ;;  %v908_v45 = vld [vmem:[%s1841_s8 + $0x1b0] sm:$0xff] }
 0x18e   : > { %735 = vmatprep.subr.mxu1 %v650_v47  ;;  %v906_v47 = vld [vmem:[%s1841_s8 + $0x1a0] sm:$0xff] }
 0x18f   : > { %581 = vmatpush2.xpose.msra.mxu0 %v498_v50  ;;  %v903_v50 = vld [vmem:[%s1841_s8 + $0x188] sm:$0xff] }
 0x190   : > { %582 = vmatprep.subr.mxu0 %v497_v52  ;;  %v901_v52 = vld [vmem:[%s1841_s8 + $0x178] sm:$0xff] }
 0x191   : > { %736 = vmatpush2.xpose.msra.mxu1 %v649_v49  ;;  %v904_v49 = vld [vmem:[%s1841_s8 + $0x190] sm:$0xff] }
 0x192   : > { %737 = vmatprep.subr.mxu1 %v648_v51  ;;  %v902_v51 = vld [vmem:[%s1841_s8 + $0x180] sm:$0xff] }
 0x193   : > { %583 = vmatpush2.xpose.msra.mxu0 %v496_v54  ;;  %v899_v54 = vld [vmem:[%s1841_s8 + $0x168] sm:$0xff] }
 0x194   : > { %584 = vmatprep.subr.mxu0 %v495_v56  ;;  %v897_v56 = vld [vmem:[%s1841_s8 + $0x158] sm:$0xff] }
 0x195   : > { %738 = vmatpush2.xpose.msra.mxu1 %v647_v53  ;;  %v900_v53 = vld [vmem:[%s1841_s8 + $0x170] sm:$0xff] }
 0x196   : > { %739 = vmatprep.subr.mxu1 %v646_v55  ;;  %v898_v55 = vld [vmem:[%s1841_s8 + $0x160] sm:$0xff] }
 0x197   : > { %585 = vmatpush2.xpose.msra.mxu0 %v494_v58  ;;  %v895_v58 = vld [vmem:[%s1841_s8 + $0x148] sm:$0xff] }
 0x198   : > { %586 = vmatprep.subr.mxu0 %v493_v59  ;;  %v894_v59 = vld [vmem:[%s1841_s8 + $0x140] sm:$0xff] }
 0x199   : > { %740 = vmatpush2.xpose.msra.mxu1 %v645_v57  ;;  %v896_v57 = vld [vmem:[%s1841_s8 + $0x150] sm:$0xff] }
 0x19a   : > { %1227 = vmatprep.subr.mxu1 %v885_v61 }
 0x19b   : > { %587 = vmatpush2.xpose.msra.mxu0 %v492_v63  ;;  %v890_v63 = vld [vmem:[%s1841_s8 + $0x120] sm:$0xff] }
 0x19c   : > { %742 = vmatmul.mubr.f32.vlgmr.msra.gmra.mxu1 %v452_v60  ;;  %918 = vmatprep.subr.mxu0 %v885_v61  ;;  %v892_v61 = vld [vmem:[%s1841_s8 + $0x130] sm:$0xff] }
 0x19d   : > { %747 = vmatprep.mubr.f32.mxu1 %v455_v62  ;;  %1259 = vmatpush1.xpose.msra.mxu1 %v884_v1 }
 0x19e   : > { %1228 = vmatprep.subr.mxu1 %v883_v3  ;;  %589 = vmatmul.mubr.f32.vlgmr.msra.gmra.mxu0 %v452_v60  ;;  %v893_v60 = vld [vmem:[%s1841_s8 + $0x138] sm:$0xff] }
 0x19f   : > { %594 = vmatprep.mubr.f32.mxu0 %v455_v62  ;;  %919 = vmatpush1.xpose.msra.mxu0 %v884_v1  ;;  %v891_v62 = vld [vmem:[%s1841_s8 + $0x128] sm:$0xff]  ;;  %v888_v1 = vld [vmem:[%s1841_s8 + $0x110] sm:$0xff] }
 0x1a0   : > { %748 = vmatmul.mubr.f32.gmra.mxu1 %v454_v0  ;;  %920 = vmatprep.subr.mxu0 %v883_v3  ;;  %v886_v3 = vld [vmem:[%s1841_s8 + $0x100] sm:$0xff] }
 0x1a1   : > { %753 = vmatprep.mubr.f32.mxu1 %v457_v2  ;;  %1260 = vmatpush1.xpose.msra.mxu1 %v882_v5 }
 0x1a2   : > { %1229 = vmatprep.subr.mxu1 %v881_v7  ;;  %595 = vmatmul.mubr.f32.gmra.mxu0 %v454_v0  ;;  %v889_v0 = vld [vmem:[%s1841_s8 + $0x118] sm:$0xff] }
 0x1a3   : > { %600 = vmatprep.mubr.f32.mxu0 %v457_v2  ;;  %921 = vmatpush1.xpose.msra.mxu0 %v882_v5  ;;  %v887_v2 = vld [vmem:[%s1841_s8 + $0x108] sm:$0xff] }
 0x1a4   : > { %754 = vmatmul.mubr.f32.gmra.mxu1 %v456_v4  ;;  %922 = vmatprep.subr.mxu0 %v881_v7 }
 0x1a5   : > { %759 = vmatprep.mubr.f32.mxu1 %v459_v6  ;;  %1261 = vmatpush1.xpose.msra.mxu1 %v880_v9 }
 0x1a6   : > { %1230 = vmatprep.subr.mxu1 %v879_v10  ;;  %601 = vmatmul.mubr.f32.gmra.mxu0 %v456_v4 }
 0x1a7   : > { %606 = vmatprep.mubr.f32.mxu0 %v459_v6  ;;  %923 = vmatpush1.xpose.msra.mxu0 %v880_v9 }
 0x1a8   : > { %760 = vmatmul.mubr.f32.gmra.mxu1 %v458_v8  ;;  %924 = vmatprep.subr.mxu0 %v879_v10 }
 0x1a9   : > { %1262 = vmatpush1.xpose.msra.mxu1 %v878_v11 }
 0x1aa   : > { %1231 = vmatprep.subr.mxu1 %v877_v12  ;;  %607 = vmatmul.mubr.f32.gmra.mxu0 %v458_v8 }
 0x1ab   : > { %925 = vmatpush1.xpose.msra.mxu0 %v878_v11 }
 0x1ac   : > { %926 = vmatprep.subr.mxu0 %v877_v12 }
 0x1ad   : > { %1263 = vmatpush1.xpose.msra.mxu1 %v876_v13 }
 0x1ae   : > { %1232 = vmatprep.subr.mxu1 %v875_v14 }
 0x1af   : > { %927 = vmatpush1.xpose.msra.mxu0 %v876_v13 }
 0x1b0   : > { %928 = vmatprep.subr.mxu0 %v875_v14 }
 0x1b1   : > { %1264 = vmatpush1.xpose.msra.mxu1 %v874_v15 }
 0x1b2   : > { %1233 = vmatprep.subr.mxu1 %v873_v16 }
 0x1b3   : > { %929 = vmatpush1.xpose.msra.mxu0 %v874_v15 }
 0x1b4   : > { %930 = vmatprep.subr.mxu0 %v873_v16 }
 0x1b5   : > { %1265 = vmatpush1.xpose.msra.mxu1 %v872_v17 }
 0x1b6   : > { %1234 = vmatprep.subr.mxu1 %v871_v18 }
 0x1b7   : > { %931 = vmatpush1.xpose.msra.mxu0 %v872_v17 }
 0x1b8   : > { %932 = vmatprep.subr.mxu0 %v871_v18 }
 0x1b9   : > { %1266 = vmatpush1.xpose.msra.mxu1 %v870_v19 }
 0x1ba   : > { %1235 = vmatprep.subr.mxu1 %v869_v20 }
 0x1bb   : > { %933 = vmatpush1.xpose.msra.mxu0 %v870_v19 }
 0x1bc   : > { %934 = vmatprep.subr.mxu0 %v869_v20 }
 0x1bd   : > { %1267 = vmatpush1.xpose.msra.mxu1 %v868_v21 }
 0x1be   : > { %1236 = vmatprep.subr.mxu1 %v867_v22 }
 0x1bf   : > { %935 = vmatpush1.xpose.msra.mxu0 %v868_v21 }
 0x1c0   : > { %936 = vmatprep.subr.mxu0 %v867_v22 }
 0x1c1   : > { %1268 = vmatpush1.xpose.msra.mxu1 %v866_v23 }
 0x1c2   : > { %1237 = vmatprep.subr.mxu1 %v865_v24 }
 0x1c3   : > { %937 = vmatpush1.xpose.msra.mxu0 %v866_v23 }
 0x1c4   : > { %938 = vmatprep.subr.mxu0 %v865_v24 }
 0x1c5   : > { %1269 = vmatpush1.xpose.msra.mxu1 %v864_v25 }
 0x1c6   : > { %1238 = vmatprep.subr.mxu1 %v863_v26 }
 0x1c7   : > { %939 = vmatpush1.xpose.msra.mxu0 %v864_v25 }
 0x1c8   : > { %940 = vmatprep.subr.mxu0 %v863_v26 }
 0x1c9   : > { %1270 = vmatpush1.xpose.msra.mxu1 %v862_v27 }
 0x1ca   : > { %1239 = vmatprep.subr.mxu1 %v861_v28 }
 0x1cb   : > { %941 = vmatpush1.xpose.msra.mxu0 %v862_v27 }
 0x1cc   : > { %942 = vmatprep.subr.mxu0 %v861_v28 }
 0x1cd   : > { %1271 = vmatpush1.xpose.msra.mxu1 %v860_v29 }
 0x1ce   : > { %1240 = vmatprep.subr.mxu1 %v859_v30 }
 0x1cf   : > { %943 = vmatpush1.xpose.msra.mxu0 %v860_v29 }
 0x1d0   : > { %944 = vmatprep.subr.mxu0 %v859_v30 }
 0x1d1   : > { %1272 = vmatpush1.xpose.msra.mxu1 %v858_v31 }
 0x1d2   : > { %1241 = vmatprep.subr.mxu1 %v857_v32 }
 0x1d3   : > { %945 = vmatpush1.xpose.msra.mxu0 %v858_v31 }
 0x1d4   : > { %946 = vmatprep.subr.mxu0 %v857_v32 }
 0x1d5   : > { %1273 = vmatpush1.xpose.msra.mxu1 %v856_v33 }
 0x1d6   : > { %1242 = vmatprep.subr.mxu1 %v855_v34 }
 0x1d7   : > { %947 = vmatpush1.xpose.msra.mxu0 %v856_v33 }
 0x1d8   : > { %948 = vmatprep.subr.mxu0 %v855_v34 }
 0x1d9   : > { %1274 = vmatpush1.xpose.msra.mxu1 %v854_v35 }
 0x1da   : > { %1243 = vmatprep.subr.mxu1 %v917_v36 }
 0x1db   : > { %949 = vmatpush1.xpose.msra.mxu0 %v854_v35 }
 0x1dc   : > { %950 = vmatprep.subr.mxu0 %v917_v36 }
 0x1dd   : > { %1275 = vmatpush2.xpose.msra.mxu1 %v916_v37 }
 0x1de   : > { %1244 = vmatprep.subr.mxu1 %v915_v38 }
 0x1df   : > { %951 = vmatpush2.xpose.msra.mxu0 %v916_v37 }
 0x1e0   : > { %952 = vmatprep.subr.mxu0 %v915_v38 }
 0x1e1   : > { %1276 = vmatpush2.xpose.msra.mxu1 %v914_v39 }
 0x1e2   : > { %1245 = vmatprep.subr.mxu1 %v913_v40 }
 0x1e3   : > { %953 = vmatpush2.xpose.msra.mxu0 %v914_v39 }
 0x1e4   : > { %954 = vmatprep.subr.mxu0 %v913_v40 }
 0x1e5   : > { %1277 = vmatpush2.xpose.msra.mxu1 %v912_v41 }
 0x1e6   : > { %1246 = vmatprep.subr.mxu1 %v911_v42 }
 0x1e7   : > { %955 = vmatpush2.xpose.msra.mxu0 %v912_v41 }
 0x1e8   : > { %956 = vmatprep.subr.mxu0 %v911_v42 }
 0x1e9   : > { %1278 = vmatpush2.xpose.msra.mxu1 %v910_v43 }
 0x1ea   : > { %1247 = vmatprep.subr.mxu1 %v909_v44 }
 0x1eb   : > { %957 = vmatpush2.xpose.msra.mxu0 %v910_v43 }
 0x1ec   : > { %958 = vmatprep.subr.mxu0 %v909_v44 }
 0x1ed   : > { %1279 = vmatpush2.xpose.msra.mxu1 %v908_v45 }
 0x1ee   : > { %1248 = vmatprep.subr.mxu1 %v907_v46 }
 0x1ef   : > { %959 = vmatpush2.xpose.msra.mxu0 %v908_v45 }
 0x1f0   : > { %960 = vmatprep.subr.mxu0 %v907_v46 }
 0x1f1   : > { %1280 = vmatpush2.xpose.msra.mxu1 %v906_v47 }
 0x1f2   : > { %1249 = vmatprep.subr.mxu1 %v905_v48 }
 0x1f3   : > { %961 = vmatpush2.xpose.msra.mxu0 %v906_v47 }
 0x1f4   : > { %962 = vmatprep.subr.mxu0 %v905_v48 }
 0x1f5   : > { %1281 = vmatpush2.xpose.msra.mxu1 %v904_v49 }
 0x1f6   : > { %1250 = vmatprep.subr.mxu1 %v903_v50 }
 0x1f7   : > { %963 = vmatpush2.xpose.msra.mxu0 %v904_v49 }
 0x1f8   : > { %964 = vmatprep.subr.mxu0 %v903_v50 }
 0x1f9   : > { %1282 = vmatpush2.xpose.msra.mxu1 %v902_v51 }
 0x1fa   : > { %1251 = vmatprep.subr.mxu1 %v901_v52 }
 0x1fb   : > { %965 = vmatpush2.xpose.msra.mxu0 %v902_v51 }
 0x1fc   : > { %966 = vmatprep.subr.mxu0 %v901_v52 }
 0x1fd   : > { %1283 = vmatpush2.xpose.msra.mxu1 %v900_v53 }
 0x1fe   : > { %1252 = vmatprep.subr.mxu1 %v899_v54 }
 0x1ff   : > { %967 = vmatpush2.xpose.msra.mxu0 %v900_v53 }
 0x200   : > { %968 = vmatprep.subr.mxu0 %v899_v54 }
 0x201   : > { %1284 = vmatpush2.xpose.msra.mxu1 %v898_v55 }
 0x202   : > { %1253 = vmatprep.subr.mxu1 %v897_v56 }
 0x203   : > { %969 = vmatpush2.xpose.msra.mxu0 %v898_v55 }
 0x204   : > { %970 = vmatprep.subr.mxu0 %v897_v56 }
 0x205   : > { %1285 = vmatpush2.xpose.msra.mxu1 %v896_v57 }
 0x206   : > { %1254 = vmatprep.subr.mxu1 %v895_v58 }
 0x207   : > { %971 = vmatpush2.xpose.msra.mxu0 %v896_v57 }
 0x208   : > { %972 = vmatprep.subr.mxu0 %v895_v58 }
 0x209   : > { %1286 = vmatpush2.xpose.msra.mxu1 %v894_v59 }
 0x20a   : > { %1255 = vmatprep.subr.mxu1 %v893_v60 }
 0x20b   : > { %973 = vmatpush2.xpose.msra.mxu0 %v894_v59 }
 0x20c   : > { %974 = vmatprep.subr.mxu0 %v893_v60 }
 0x20d   : > { %1287 = vmatpush2.xpose.msra.mxu1 %v892_v61 }
 0x20e   : > { %1256 = vmatprep.subr.mxu1 %v891_v62 }
 0x20f   : > { %975 = vmatpush2.xpose.msra.mxu0 %v892_v61 }
 0x210   : > { %976 = vmatprep.subr.mxu0 %v891_v62 }
 0x211   : > { %1288 = vmatpush2.xpose.msra.mxu1 %v890_v63 }
 0x212   : > { %1257 = vmatprep.subr.mxu1 %v889_v0 }
 0x213   : > { %977 = vmatpush2.xpose.msra.mxu0 %v890_v63 }
 0x214   : > { %978 = vmatprep.subr.mxu0 %v889_v0 }
 0x215   : > { %1289 = vmatpush2.xpose.msra.mxu1 %v888_v1 }
 0x216   : > { %1258 = vmatprep.subr.mxu1 %v887_v2 }
 0x217   : > { %979 = vmatpush2.xpose.msra.mxu0 %v888_v1 }
 0x218   : > { %980 = vmatprep.subr.mxu0 %v887_v2 }
 0x219   : > { %1290 = vmatpush2.xpose.msra.mxu1 %v886_v3 }
 0x21b   : > { %981 = vmatpush2.xpose.msra.mxu0 %v886_v3 }
 0x25c   : > { %v2046_v4 = vpop.f32.mrf.mxu1 }
 0x25d   : > { %v766_v5 = vmul.f32 %v2046_v4, %v2046_v4 }
 0x25e   : > { %v2050_v6 = vpop.f32.mrf.mxu1  ;;  %v590_v42 = vpop.f32.mrf.mxu0 }
 0x25f   : > { %v774_v7 = vmul.f32 %v766_v5, %v2046_v4  ;;  %v767_v8 = vmul.f32 %v2050_v6, %v2050_v6 }
 0x260   : > { %v2055_v9 = vpop.f32.mrf.mxu1  ;;  %v592_v50 = vpop.f32.mrf.mxu0 }
 0x261   : > { %v782_v10 = vmul.f32 0.044715, %v774_v7  ;;  %v775_v11 = vmul.f32 %v767_v8, %v2050_v6  ;;  %v768_v12 = vmul.f32 %v2055_v9, %v2055_v9 }
 0x262   : > { %v2060_v13 = vpop.f32.mrf.mxu1  ;;  %v596_v55 = vpop.f32.mrf.mxu0 }
 0x263   : > { %v790_v14 = vadd.f32 %v782_v10, %v2046_v4  ;;  %v783_v15 = vmul.f32 0.044715, %v775_v11  ;;  %v776_v16 = vmul.f32 %v768_v12, %v2055_v9  ;;  %v769_v17 = vmul.f32 %v2060_v13, %v2060_v13 }
 0x264   : > { %v2066_v18 = vpop.f32.mrf.mxu1  ;;  %v598_v61 = vpop.f32.mrf.mxu0 }
 0x265   : > { %v798_v19 = vmul.f32 0.7978846, %v790_v14  ;;  %v791_v20 = vadd.f32 %v783_v15, %v2050_v6  ;;  %v784_v21 = vmul.f32 0.044715, %v776_v16  ;;  %v777_v22 = vmul.f32 %v769_v17, %v2060_v13 }
 0x266   : > { %v770_v23 = vmul.f32 %v2066_v18, %v2066_v18  ;;  %v2072_v24 = vpop.f32.mrf.mxu1  ;;  %v602_v7 = vpop.f32.mrf.mxu0 }
 0x267   : > { %1398 = vtanh.f32 %v798_v19  ;;  %v799_v25 = vmul.f32 0.7978846, %v791_v20  ;;  %v792_v26 = vadd.f32 %v784_v21, %v2055_v9  ;;  %v785_v27 = vmul.f32 0.044715, %v777_v22 }
 0x268   : > { %v778_v28 = vmul.f32 %v770_v23, %v2066_v18  ;;  %v771_v29 = vmul.f32 %v2072_v24, %v2072_v24  ;;  %v2078_v30 = vpop.f32.mrf.mxu1 }
 0x269   : > { %1400 = vtanh.f32 %v799_v25  ;;  %v800_v31 = vmul.f32 0.7978846, %v792_v26  ;;  %v793_v32 = vadd.f32 %v785_v27, %v2060_v13  ;;  %v772_v33 = vmul.f32 %v2078_v30, %v2078_v30 }
 0x26a   : > { %v786_v34 = vmul.f32 0.044715, %v778_v28  ;;  %v779_v35 = vmul.f32 %v771_v29, %v2072_v24  ;;  %v2084_v36 = vpop.f32.mrf.mxu1 }
 0x26b   : > { %1402 = vtanh.f32 %v800_v31  ;;  %v801_v37 = vmul.f32 0.7978846, %v793_v32  ;;  %v780_v38 = vmul.f32 %v772_v33, %v2078_v30  ;;  %v773_v39 = vmul.f32 %v2084_v36, %v2084_v36 }
 0x26c   : > { %v794_v40 = vadd.f32 %v786_v34, %v2066_v18  ;;  %v787_v41 = vmul.f32 0.044715, %v779_v35 }
 0x26d   : > { %1404 = vtanh.f32 %v801_v37  ;;  %v788_v43 = vmul.f32 0.044715, %v780_v38  ;;  %v781_v44 = vmul.f32 %v773_v39, %v2084_v36 }
 0x26e   : > { %v802_v45 = vmul.f32 0.7978846, %v794_v40  ;;  %v795_v46 = vadd.f32 %v787_v41, %v2072_v24  ;;  %v847_v41 = vld [vmem:[#allocation3 + $0x18] sm:$0xff] }
 0x26f   : > { %v796_v47 = vadd.f32 %v788_v43, %v2078_v30  ;;  %v789_v48 = vmul.f32 0.044715, %v781_v44  ;;  %v848_v43 = vld [vmem:[#allocation3 + $0x10] sm:$0xff] }
 0x270   : > { %1406 = vtanh.f32 %v802_v45  ;;  %v803_v49 = vmul.f32 0.7978846, %v795_v46  ;;  %v849_v46 = vld [vmem:[#allocation3 + $0x20] sm:$0xff] }
 0x271   : > { %v804_v51 = vmul.f32 0.7978846, %v796_v47  ;;  %v797_v52 = vadd.f32 %v789_v48, %v2084_v36  ;;  %v850_v48 = vld [vmem:[#allocation3 + $0x28] sm:$0xff] }
 0x272   : > { %1408 = vtanh.f32 %v803_v49 }
 0x273   : > { %1410 = vtanh.f32 %v804_v51  ;;  %v805_v53 = vmul.f32 0.7978846, %v797_v52 }
 0x274   : > { %v1399_v54 = vpop.eup %1398 }
 0x275   : > { %1412 = vtanh.f32 %v805_v53  ;;  %v814_v56 = vadd.f32 1.0, %v1399_v54  ;;  %v852_v53 = vld [vmem:[#allocation3 + $0x30] sm:$0xff] }
 0x276   : > { %v1401_v57 = vpop.eup %1400 }
 0x277   : > { %v822_v58 = vmul.f32 0.5, %v814_v56  ;;  %v815_v59 = vadd.f32 1.0, %v1401_v57  ;;  %v853_v56 = vld [vmem:[#allocation3 + $0x38] sm:$0xff] }
 0x278   : > { %v1403_v60 = vpop.eup %1402 }
 0x279   : > { %v823_v62 = vmul.f32 0.5, %v815_v59  ;;  %v816_v63 = vadd.f32 1.0, %v1403_v60  ;;  %v830_v1 = vmul.f32 %v822_v58, %v2046_v4  ;;  %v604_v4 = vpop.f32.mrf.mxu0 }
 0x27a   : > { %v1405_v0 = vpop.eup %1404 }
 0x27b   : > { %v831_v2 = vmul.f32 %v823_v62, %v2050_v6  ;;  %v824_v3 = vmul.f32 0.5, %v816_v63  ;;  %v817_v5 = vadd.f32 1.0, %v1405_v0  ;;  %v838_v12 = vmul.f32 %v830_v1, %v590_v42  ;;  %v608_v31 = vpop.f32.mrf.mxu0 }
 0x27d   : > { %v1407_v8 = vpop.eup %1406  ;;  %v839_v10 = vmul.f32 %v831_v2, %v592_v50  ;;  %v825_v11 = vmul.f32 0.5, %v817_v5  ;;  %v832_v14 = vmul.f32 %v824_v3, %v2055_v9  ;;  %v610_v37 = vpop.f32.mrf.mxu0  ;;  %v851_v50 = vld [vmem:[#allocation3 + $0x8] sm:$0xff] }
 0x27e   : > { %v818_v15 = vadd.f32 1.0, %v1407_v8 }
 0x27f   : > { %v1409_v16 = vpop.eup %1408  ;;  %v833_v17 = vmul.f32 %v825_v11, %v2060_v13  ;;  %982 = vmatprep.mubr.f32.mxu0 %v839_v10  ;;  %v840_v25 = vmul.f32 %v832_v14, %v596_v55 }
 0x280   : > { %v1411_v19 = vpop.eup %1410  ;;  %v826_v20 = vmul.f32 0.5, %v818_v15  ;;  %983 = vmatmul.mubr.f32.vlgmr.msra.gmra.mxu0 %v838_v12  ;;  %v819_v21 = vadd.f32 1.0, %v1409_v16 }
 0x281   : > { %v841_v6 = vmul.f32 %v833_v17, %v598_v61  ;;  %v820_v22 = vadd.f32 1.0, %v1411_v19 }
 0x282   : > { %v1413_v23 = vpop.eup %1412  ;;  %v827_v26 = vmul.f32 0.5, %v819_v21  ;;  %v834_v27 = vmul.f32 %v826_v20, %v2066_v18  ;;  %v846_v18 = vld [vmem:[#allocation3] sm:$0xff] }
 0x283   : > { %988 = vmatprep.mubr.f32.mxu0 %v841_v6  ;;  %v828_v28 = vmul.f32 0.5, %v820_v22  ;;  %v821_v9 = vadd.f32 1.0, %v1413_v23 }
 0x284   : > { %v835_v29 = vmul.f32 %v827_v26, %v2072_v24  ;;  %989 = vmatmul.mubr.f32.gmra.mxu0 %v840_v25  ;;  %v842_v33 = vmul.f32 %v834_v27, %v602_v7 }
 0x285   : > { %v829_v13 = vmul.f32 0.5, %v821_v9  ;;  %v836_v34 = vmul.f32 %v828_v28, %v2078_v30 }
 0x286   : > { %v843_v32 = vmul.f32 %v835_v29, %v604_v4 }
 0x287   : > { %v837_v35 = vmul.f32 %v829_v13, %v2084_v36  ;;  %v844_v39 = vmul.f32 %v836_v34, %v608_v31 }
 0x288   : > { %994 = vmatprep.mubr.f32.mxu1 %v843_v32 }
 0x289   : > { %v845_v38 = vmul.f32 %v837_v35, %v610_v37  ;;  %995 = vmatmul.mubr.f32.vlgmr.msra.gmra.mxu1 %v842_v33 }
 0x28b   : > { %1000 = vmatprep.mubr.f32.mxu1 %v845_v38 }
 0x28d   : > { %1001 = vmatmul.mubr.f32.gmra.mxu1 %v844_v39 }
 0x340   : > { %v984_v40 = vpop.f32.mrf.mxu0 }
 0x341   : > { %v1007_v24 = vadd.f32 %v984_v40, %v846_v18 }
 0x342   : > { %v986_v42 = vpop.f32.mrf.mxu0 }
 0x343   : > { %1015 = vst [vmem:[#allocation3] sm:$0xff] %v1007_v24  ;;  %v1008_v44 = vadd.f32 %v986_v42, %v847_v41 }
 0x344   : > { %v990_v45 = vpop.f32.mrf.mxu0 }
 0x345   : > { %1016 = vst [vmem:[#allocation3 + $0x18] sm:$0xff] %v1008_v44  ;;  %v1009_v30 = vadd.f32 %v990_v45, %v848_v43 }
 0x346   : > { %v992_v36 = vpop.f32.mrf.mxu0 }
 0x347   : > { %1017 = vst [vmem:[#allocation3 + $0x10] sm:$0xff] %v1009_v30  ;;  %v1010_v47 = vadd.f32 %v992_v36, %v849_v46 }
 0x349   : > { %1018 = vst [vmem:[#allocation3 + $0x20] sm:$0xff] %v1010_v47  ;;  %v996_v49 = vpop.f32.mrf.mxu1 }
 0x34a   : > { %v1011_v51 = vadd.f32 %v996_v49, %v850_v48 }
 0x34b   : > { %v998_v52 = vpop.f32.mrf.mxu1 }
 0x34c   : > { %1019 = vst [vmem:[#allocation3 + $0x28] sm:$0xff] %v1011_v51  ;;  %v1012_v54 = vadd.f32 %v998_v52, %v851_v50 }
 0x34d   : > { %v1002_v55 = vpop.f32.mrf.mxu1 }
 0x34e   : > { %1020 = vst [vmem:[#allocation3 + $0x8] sm:$0xff] %v1012_v54  ;;  %v1013_v57 = vadd.f32 %v1002_v55, %v852_v53  ;;  %1026 = sbr.rel (%p1217_p6) target bundleno = 861 (0x35d), region = 68 }
 0x34f   : > { %v1004_v58 = vpop.f32.mrf.mxu1 }
 0x350   : > { %1021 = vst [vmem:[#allocation3 + $0x30] sm:$0xff] %v1013_v57  ;;  %v1014_v59 = vadd.f32 %v1004_v58, %v853_v56 }
 0x352   : > { %1022 = vst [vmem:[#allocation3 + $0x38] sm:$0xff] %v1014_v59 }
 0x353   : > { %v1027_v60 = vld [vmem:[#allocation4] sm:$0xff]  ;;  %v1028_v62 = vld [vmem:[#allocation4 + $0x8] sm:$0xff]  ;;  %v1036_v0 = vld [vmem:[#allocation3 + $0x18] sm:$0xff] }
 0x354   : > { %v1035_v61 = vld [vmem:[#allocation3] sm:$0xff]  ;;  %v1029_v1 = vld [vmem:[#allocation4 + $0x10] sm:$0xff]  ;;  %v1044_v3 = vadd.f32 %v1036_v0, %v1028_v62  ;;  %v1030_v7 = vld [vmem:[#allocation4 + $0x18] sm:$0xff] }
 0x355   : > { %v1043_v63 = vadd.f32 %v1035_v61, %v1027_v60  ;;  %v1037_v2 = vld [vmem:[#allocation3 + $0x10] sm:$0xff]  ;;  %v1038_v8 = vld [vmem:[#allocation3 + $0x20] sm:$0xff]  ;;  %v1039_v12 = vld [vmem:[#allocation3 + $0x28] sm:$0xff] }
 0x356   : > { %v1045_v5 = vadd.f32 %v1037_v2, %v1029_v1  ;;  %v1031_v10 = vld [vmem:[#allocation4 + $0x20] sm:$0xff]  ;;  %v1046_v11 = vadd.f32 %v1038_v8, %v1030_v7  ;;  %v1032_v14 = vld [vmem:[#allocation4 + $0x28] sm:$0xff]  ;;  %1052 = vst [vmem:[#allocation12 + $0x8] sm:$0xff] %v1044_v3  ;;  %v1033_v19 = vld [vmem:[#allocation4 + $0x30] sm:$0xff] }
 0x357   : > { %1051 = vst [vmem:[#allocation12] sm:$0xff] %v1043_v63  ;;  %v1040_v15 = vld [vmem:[#allocation3 + $0x8] sm:$0xff]  ;;  %v1047_v16 = vadd.f32 %v1039_v12, %v1031_v10  ;;  %v1041_v20 = vld [vmem:[#allocation3 + $0x30] sm:$0xff]  ;;  %v1034_v4 = vld [vmem:[#allocation4 + $0x38] sm:$0xff] }
 0x358   : > { %1053 = vst [vmem:[#allocation12 + $0x10] sm:$0xff] %v1045_v5  ;;  %v1048_v17 = vadd.f32 %v1040_v15, %v1032_v14  ;;  %1054 = vst [vmem:[#allocation12 + $0x18] sm:$0xff] %v1046_v11  ;;  %v1049_v21 = vadd.f32 %v1041_v20, %v1033_v19 }
 0x359   : > { %v1042_v6 = vld [vmem:[#allocation3 + $0x38] sm:$0xff]  ;;  %1055 = vst [vmem:[#allocation12 + $0x20] sm:$0xff] %v1047_v16 }
 0x35a   : > { %1056 = vst [vmem:[#allocation12 + $0x28] sm:$0xff] %v1048_v17  ;;  %v1050_v22 = vadd.f32 %v1042_v6, %v1034_v4  ;;  %1057 = vst [vmem:[#allocation12 + $0x30] sm:$0xff] %v1049_v21 }
 0x35c   : > { %1058 = vst [vmem:[#allocation12 + $0x38] sm:$0xff] %v1050_v22 }
 0x35d PF: > { %p1331_p12 = scmp.eq.s32.totalorder %s1709_s24, 1  ;;  %s1647_s21 = smov [#allocation12]  }
 0x35e   : > { %s1069_s26 = sshll.u32 %s1647_s21, 4  ;;  %s1070_s26 = int_to_ptr.vmem [resolvable:$true] %s1069_s26 }
 0x35f   : > { %s1550_s7 = scalar_lea.vmem %s1070_s26, 1024  ;;  %p1557_p3 = scmp.lt.s32.totalorder %s1070_s26, %s1070_s26 }
 0x360   : > { %p1551_p13 = scmp.ne.s32.totalorder %s1070_s26, %s1550_s7  ;;  %p1558_p0 = scmp.lt.s32.totalorder %s1550_s7, %s1550_s7 }
 0x362   : > { %p1552_p9 = pnand %p1551_p13, %p1331_p12  ;;  %p1559_p11 = por %p1558_p0, %p1557_p3 }
 0x364   : > { %p1553_p4 = pneg %p1552_p9 }
 0x366   : > { %p1560_p1 = pnand %p1559_p11, %p1553_p4 }
 0x368   : > { %1563 = shalt.err (!%p1560_p1)
}
 0x369   : > { %s1648_s28 = smov 256   ;;  %s1649_s2 = smov 16  }
 0x36a   : > { %1306 = dma.vmem_to_hbm [thread:$0]  (%p1331_p12), %s1070_s26, 1024, %s2138_s5, [#allocation6], %s1648_s28, %s1648_s28, %s1649_s2  }
 0x36b   : > { %1611 = dma.done.wait (%p1331_p12), [#allocation6], 1024  }
 0x36c   : > { %1613 = vsyncadd (%p1331_p12), [#allocation6], 4294966272 }
 0x36d PF: > { %s18_s23 = sadd.s32 1, %s1636_s23   ;;  %s2160_s10 = sld [smem:[#allocation17_spill]] }
 0x36e   : > { %p15_p10 = scmp.ge.s32.totalorder %s18_s23, 4   ;;  %s2161_s18 = smov %s1620_s19 }
 0x36f   : > { %s2162_s19 = smov %s1624_s20  ;;  %s2163_s20 = smov %s1772_s29 }
 0x370   : > { %s2164_s21 = smov %s1632_s22  ;;  %17 = sbr.rel (!%p15_p10) target bundleno = 8 (0x8), region = 116 }
 0x373   : > { %s2165_s22 = smov %s2160_s10 }
 0x375   :  { %1085 = vsyncpa [#allocation5], 1 }
 0x376   :  { %1087 = vsyncpa [#allocation5 + $0x1], 1 }
 0x377   :  { %1088 = vsyncpa [#allocation8], 1 }
 0x378   :  { %1089 = vsyncpa [#allocation6], 1 }
 0x379   :  { %1091 = vsyncpa [#allocation6 + $0x1], 1 }

</bundles_post_ra>
